<compile_context>
chip_gen: v7x
topology: tpu7x:2x2x1
jax: 0.10.0
libtpu: 0.0.40
codegen_flags: <defaults>
</compile_context>

<pallas_src>
import math

import numpy as np
import jax
import jax.numpy as jnp
from jax import lax
from jax.experimental import pallas as pl
from jax.experimental.pallas import tpu as pltpu


# -----------------------------------------------------------------------------
# helpers
# -----------------------------------------------------------------------------
def _round_up(x, m):
    return (x + m - 1) // m * m


def _pick_row_tile(h, w, target_rows=1024):
    """Output-row tile TR such that TR*W ~= target matmul M-rows and TR | H."""
    tr = max(1, min(h, target_rows // max(w, 1)))
    while h % tr:
        tr -= 1
    return tr


def _vmem_limit(block_bytes):
    # 2x for double buffering + slack; clamp so it is valid on v5e/v6e (128 MiB)
    # and v7x (64 MiB physical VMEM).
    return int(min(max(2 * block_bytes + (1 << 20), 16 << 20), 48 << 20))


def _interp_matrix(out_size, in_size):
    """Bilinear interpolation matrix (align_corners=True), numpy (out, in)."""
    m = np.zeros((out_size, in_size), np.float32)
    if out_size == 1:
        m[0, 0] = 1.0
        return m
    scale = (in_size - 1) / (out_size - 1)
    for i in range(out_size):
        src = scale * i
        lo = int(np.floor(src))
        hi = min(lo + 1, in_size - 1)
        frac = src - lo
        m[i, lo] += 1.0 - frac
        m[i, hi] += frac
    return m


# -----------------------------------------------------------------------------
# Conv2d(C, 9C, 3, 1, 1) + bias + ReLU + PixelShuffle(3), fused, NHWC in/out
# -----------------------------------------------------------------------------
def conv3x3_relu_pixelshuffle(x_nhwc, w, b):
    """x: (N, H, W, C) f32, w: (9C, C, 3, 3) PyTorch layout, b: (9C,).
    Returns (N, 3H, 3W, C) f32 (conv + ReLU + pixel shuffle)."""
    N, H, W, C = x_nhwc.shape
    cout = 9 * C
    cout_p = _round_up(cout, 128)          # lane-dense output channels

    # Weights: (oc = c*9+rh*3+rw, cin, kh, kw)
    #   -> (tap = kh*3+kw, cin, oc' = (rh*3+rw)*C + c), zero-padded to cout_p.
    # The (rh, rw, c) output ordering makes the pixel shuffle a reshape + one
    # small transpose in NHWC (no NCHW round trip).
    w_k = jnp.transpose(w.reshape(C, 3, 3, C, 3, 3), (4, 5, 3, 1, 2, 0))
    w_k = w_k.reshape(9, C, cout)
    w_k = jnp.pad(w_k, ((0, 0), (0, 0), (0, cout_p - cout)))
    b_k = jnp.transpose(b.reshape(C, 3, 3), (1, 2, 0)).reshape(1, cout)
    b_k = jnp.pad(b_k, ((0, 0), (0, cout_p - cout)))

    xp = jnp.pad(x_nhwc, ((0, 0), (1, 1), (1, 1), (0, 0)))   # (N, H+2, W+2, C)
    Hp, Wp = H + 2, W + 2

    TR = _pick_row_tile(H, W)              # output rows per grid step
    R = H // TR
    TM = TR * W                            # matmul M-rows per grid step

    def kernel(x_ref, w_ref, b_ref, o_ref):
        # x_ref: (Hp, Wp, C) padded image (resident across the row-band axis)
        # w_ref: (9, C, cout_p)   b_ref: (1, cout_p)   o_ref: (TM, cout_p)
        row0 = pl.program_id(1) * TR
        acc = jnp.zeros((TM, cout_p), jnp.float32)
        for t in range(9):                 # 9 shifted taps accumulated on MXU
            dh, dw = t // 3, t % 3
            tap = x_ref[pl.ds(row0 + dh, TR), dw:dw + W, :]
            acc = acc + jnp.dot(tap.reshape(TM, C), w_ref[t],
                                preferred_element_type=jnp.float32)
        o_ref[...] = jnp.maximum(acc + b_ref[...], 0.0)

    blk_bytes = 4 * (Hp * Wp * C + 9 * C * cout_p + cout_p + TM * cout_p)
    y = pl.pallas_call(
        kernel,
        out_shape=jax.ShapeDtypeStruct((N, H * W, cout_p), jnp.float32),
        grid=(N, R),
        in_specs=[
            pl.BlockSpec((None, Hp, Wp, C), lambda n, r: (n, 0, 0, 0)),
            pl.BlockSpec((9, C, cout_p), lambda n, r: (0, 0, 0)),
            pl.BlockSpec((1, cout_p), lambda n, r: (0, 0)),
        ],
        out_specs=pl.BlockSpec((None, TM, cout_p), lambda n, r: (n, r, 0)),
        compiler_params=pltpu.CompilerParams(
            dimension_semantics=("parallel", "parallel"),
            vmem_limit_bytes=_vmem_limit(blk_bytes)),
    )(xp, w_k, b_k)

    # PixelShuffle(3) in NHWC using the (rh, rw, c) channel order produced above.
    y = y.reshape(N, H, W, cout_p)[..., :cout]
    y = jnp.transpose(y.reshape(N, H, W, 3, 3, C), (0, 1, 3, 2, 4, 5))
    return y.reshape(N, 3 * H, 3 * W, C)


# -----------------------------------------------------------------------------
# Bilinear (align_corners=True) upsample + ReLU, NHWC, one grid step per image
# -----------------------------------------------------------------------------
def bilinear_relu_pallas(z_nhwc, out_h, out_w):
    N, Hin, Win, C = z_nhwc.shape
    rh = jnp.asarray(_interp_matrix(out_h, Hin))                  # (out_h, Hin)
    kw_np = np.kron(_interp_matrix(out_w, Win),
                    np.eye(C, dtype=np.float32)).T                # (Win*C, out_w*C)
    woutc = out_w * C
    woutc_p = _round_up(woutc, 128)                               # lane-dense store
    kw = jnp.asarray(np.pad(kw_np, ((0, 0), (0, woutc_p - woutc))))

    z2 = z_nhwc.reshape(N, Hin, Win * C)                          # free reshape

    def kernel(z_ref, rh_ref, kw_ref, o_ref):
        # z_ref: (Hin, Win*C)  rh_ref: (out_h, Hin)  kw_ref: (Win*C, woutc_p)
        t = jnp.dot(rh_ref[...], z_ref[...], preferred_element_type=jnp.float32)
        o_ref[...] = jnp.maximum(
            jnp.dot(t, kw_ref[...], preferred_element_type=jnp.float32), 0.0)

    blk_bytes = 4 * (Hin * Win * C + out_h * Hin + Win * C * woutc_p
                     + out_h * woutc_p)
    out = pl.pallas_call(
        kernel,
        out_shape=jax.ShapeDtypeStruct((N, out_h, woutc_p), jnp.float32),
        grid=(N,),
        in_specs=[
            pl.BlockSpec((None, Hin, Win * C), lambda n: (n, 0, 0)),
            pl.BlockSpec((out_h, Hin), lambda n: (0, 0)),
            pl.BlockSpec((Win * C, woutc_p), lambda n: (0, 0)),
        ],
        out_specs=pl.BlockSpec((None, out_h, woutc_p), lambda n: (n, 0, 0)),
        compiler_params=pltpu.CompilerParams(
            dimension_semantics=("parallel",),
            vmem_limit_bytes=_vmem_limit(blk_bytes)),
    )(z2, rh, kw)
    return out[..., :woutc].reshape(N, out_h, out_w, C)


# -----------------------------------------------------------------------------
# _UpsampleBlock forward (group=1 path)
# -----------------------------------------------------------------------------
def _stages(scale):
    # bilinear scale factor applied after each conv+PixelShuffle stage, or None
    if scale in (2, 4):
        return [2.0 / 3.0] * int(math.log(scale, 2))
    if scale == 3:
        return [None]
    if scale == 5:
        return [2.0 / 3.0, 5.0 / 6.0]
    if scale == 6:
        return [2.0 / 3.0, None]
    raise ValueError(f"unsupported scale {scale}")


def init_params(n_channels, scale, key):
    """Deterministic synthetic weights (init_weights in the repo is a no-op)."""
    params = []
    for si, _ in enumerate(_stages(scale)):
        kw_, kb_ = jax.random.split(jax.random.fold_in(key, si))
        w = 0.1 * jax.random.normal(
            kw_, (9 * n_channels, n_channels, 3, 3), jnp.float32)
        b = 0.1 * jax.random.normal(kb_, (9 * n_channels,), jnp.float32)
        params.append((w, b))
    return params


def upsample_block_forward(x_nchw, params, scale):
    """x: (N, C, H, W) f32 -> (N, C, scale*H, scale*W) f32."""
    x = jnp.transpose(x_nchw, (0, 2, 3, 1))                # NCHW -> NHWC, once
    for (w, b), up in zip(params, _stages(scale)):
        y = conv3x3_relu_pixelshuffle(x, w, b)             # (N, 3H, 3W, C)
        if up is not None:
            _, Hs, Ws, _ = y.shape
            # PyTorch Upsample output-size rule: floor(size * scale_factor)
            out_h = int(math.floor(Hs * up))
            out_w = int(math.floor(Ws * up))
            y = bilinear_relu_pallas(y, out_h, out_w)
        x = y
    return jnp.transpose(x, (0, 3, 1, 2))                  # NHWC -> NCHW, once


# -----------------------------------------------------------------------------
# Pure-JAX reference (for verification)
# -----------------------------------------------------------------------------
def _ref_bilinear_ac(x, out_h, out_w):
    N, C, H, W = x.shape

    def coords(out_size, in_size):
        if out_size == 1:
            return (np.zeros(1, np.int32), np.zeros(1, np.int32),
                    np.zeros(1, np.float32))
        scale = (in_size - 1) / (out_size - 1)
        src = scale * np.arange(out_size)
        lo = np.floor(src).astype(np.int32)
        hi = np.minimum(lo + 1, in_size - 1)
        frac = (src - lo).astype(np.float32)
        return lo, hi, frac

    y0, y1, fy = coords(out_h, H)
    x0, x1, fx = coords(out_w, W)
    rows = (x[:, :, y0, :] * (1 - fy)[None, None, :, None]
            + x[:, :, y1, :] * fy[None, None, :, None])
    out = rows[:, :, :, x0] * (1 - fx) + rows[:, :, :, x1] * fx
    return out


def ref_forward(x, params, scale):
    for (w, b), up in zip(params, _stages(scale)):
        y = lax.conv_general_dilated(
            x, w, (1, 1), ((1, 1), (1, 1)),
            dimension_numbers=("NCHW", "OIHW", "NCHW"))
        y = jnp.maximum(y + b[None, :, None, None], 0.0)
        N, C9, H, W = y.shape
        C = C9 // 9
        y = (y.reshape(N, C, 3, 3, H, W)
              .transpose(0, 1, 4, 2, 5, 3)
              .reshape(N, C, 3 * H, 3 * W))
        if up is not None:
            out_h = int(math.floor(3 * H * up))
            out_w = int(math.floor(3 * W * up))
            y = jnp.maximum(_ref_bilinear_ac(y, out_h, out_w), 0.0)
        x = y
    return x


# -----------------------------------------------------------------------------
if __name__ == "__main__":
    key = jax.random.PRNGKey(0)
    n_channels, scale = 4, 2
    N, H, W = 2, 16, 16

    kx, kp = jax.random.split(key)
    x = jax.random.normal(kx, (N, n_channels, H, W), jnp.float32)
    params = init_params(n_channels, scale, kp)

    fwd = jax.jit(upsample_block_forward, static_argnums=2)
    out = jax.block_until_ready(fwd(x, params, scale))

    ref = jax.block_until_ready(ref_forward(x, params, scale))
    assert out.shape == (N, n_channels, scale * H, scale * W), out.shape
    assert jnp.allclose(out, ref, rtol=1e-4, atol=1e-4), float(
        jnp.max(jnp.abs(out - ref)))

    print("KERNEL_OK")
</pallas_src>

<mosaic_0001>
module attributes {stable_mosaic.version = 11 : i64} {
  func.func @kernel(%arg0: i32, %arg1: i32, %arg2: memref<1x18x18x4xf32, #tpu.memory_space<vmem>>, %arg3: memref<9x4x128xf32, #tpu.memory_space<vmem>>, %arg4: memref<1x128xf32, #tpu.memory_space<vmem>>, %arg5: memref<1x256x128xf32, #tpu.memory_space<vmem>>) attributes {dimension_semantics = [#tpu.dimension_semantics<parallel>, #tpu.dimension_semantics<parallel>], iteration_bounds = array<i64: 2, 1>, scalar_prefetch = 0 : i64, scratch_operands = 0 : i64, tpu.core_type = #tpu.core_type<tc>, window_params = [{transform_indices = @transform_0, window_bounds = array<i64: 1, 18, 18, 4>}, {pipeline_mode = #tpu.pipeline_mode<synchronous>, transform_indices = @transform_1, window_bounds = array<i64: 9, 4, 128>}, {pipeline_mode = #tpu.pipeline_mode<synchronous>, transform_indices = @transform_2, window_bounds = array<i64: 1, 128>}, {transform_indices = @transform_3, window_bounds = array<i64: 1, 256, 128>}]} {
    %c16_i32 = arith.constant 16 : i32
    %0 = arith.muli %arg1, %c16_i32 : i32
    %cst = arith.constant 0.000000e+00 : f32
    %1 = vector.broadcast %cst : f32 to vector<256x128xf32>
    %c0_i32 = arith.constant 0 : i32
    %2 = arith.addi %0, %c0_i32 : i32
    %c0 = arith.constant 0 : index
    %3 = arith.index_cast %2 : i32 to index
    %c0_0 = arith.constant 0 : index
    %c0_1 = arith.constant 0 : index
    %4 = vector.load %arg2[%c0, %3, %c0_0, %c0_1] : memref<1x18x18x4xf32, #tpu.memory_space<vmem>>, vector<1x16x16x4xf32>
    %5 = vector.shape_cast %4 : vector<1x16x16x4xf32> to vector<16x16x4xf32>
    %6 = vector.shape_cast %5 : vector<16x16x4xf32> to vector<256x4xf32>
    %c0_2 = arith.constant 0 : index
    %c0_3 = arith.constant 0 : index
    %c0_4 = arith.constant 0 : index
    %7 = vector.load %arg3[%c0_2, %c0_3, %c0_4] : memref<9x4x128xf32, #tpu.memory_space<vmem>>, vector<1x4x128xf32>
    %8 = vector.shape_cast %7 : vector<1x4x128xf32> to vector<4x128xf32>
    %cst_5 = arith.constant dense<0.000000e+00> : vector<256x128xf32>
    %9 = tpu.matmul %6, %8, %cst_5 {dimension_numbers = #tpu.dot_dimension_numbers<[1], [0], [0], [1], [0, 0, 1, 1], [], []>} : vector<256x4xf32>, vector<4x128xf32>, vector<256x128xf32> -> vector<256x128xf32>
    %10 = arith.addf %1, %9 : vector<256x128xf32>
    %c0_i32_6 = arith.constant 0 : i32
    %11 = arith.addi %0, %c0_i32_6 : i32
    %c0_7 = arith.constant 0 : index
    %12 = arith.index_cast %11 : i32 to index
    %c1 = arith.constant 1 : index
    %c0_8 = arith.constant 0 : index
    %13 = vector.load %arg2[%c0_7, %12, %c1, %c0_8] : memref<1x18x18x4xf32, #tpu.memory_space<vmem>>, vector<1x16x16x4xf32>
    %14 = vector.shape_cast %13 : vector<1x16x16x4xf32> to vector<16x16x4xf32>
    %15 = vector.shape_cast %14 : vector<16x16x4xf32> to vector<256x4xf32>
    %c1_9 = arith.constant 1 : index
    %c0_10 = arith.constant 0 : index
    %c0_11 = arith.constant 0 : index
    %16 = vector.load %arg3[%c1_9, %c0_10, %c0_11] : memref<9x4x128xf32, #tpu.memory_space<vmem>>, vector<1x4x128xf32>
    %17 = vector.shape_cast %16 : vector<1x4x128xf32> to vector<4x128xf32>
    %cst_12 = arith.constant dense<0.000000e+00> : vector<256x128xf32>
    %18 = tpu.matmul %15, %17, %cst_12 {dimension_numbers = #tpu.dot_dimension_numbers<[1], [0], [0], [1], [0, 0, 1, 1], [], []>} : vector<256x4xf32>, vector<4x128xf32>, vector<256x128xf32> -> vector<256x128xf32>
    %19 = arith.addf %10, %18 : vector<256x128xf32>
    %c0_i32_13 = arith.constant 0 : i32
    %20 = arith.addi %0, %c0_i32_13 : i32
    %c0_14 = arith.constant 0 : index
    %21 = arith.index_cast %20 : i32 to index
    %c2 = arith.constant 2 : index
    %c0_15 = arith.constant 0 : index
    %22 = vector.load %arg2[%c0_14, %21, %c2, %c0_15] : memref<1x18x18x4xf32, #tpu.memory_space<vmem>>, vector<1x16x16x4xf32>
    %23 = vector.shape_cast %22 : vector<1x16x16x4xf32> to vector<16x16x4xf32>
    %24 = vector.shape_cast %23 : vector<16x16x4xf32> to vector<256x4xf32>
    %c2_16 = arith.constant 2 : index
    %c0_17 = arith.constant 0 : index
    %c0_18 = arith.constant 0 : index
    %25 = vector.load %arg3[%c2_16, %c0_17, %c0_18] : memref<9x4x128xf32, #tpu.memory_space<vmem>>, vector<1x4x128xf32>
    %26 = vector.shape_cast %25 : vector<1x4x128xf32> to vector<4x128xf32>
    %cst_19 = arith.constant dense<0.000000e+00> : vector<256x128xf32>
    %27 = tpu.matmul %24, %26, %cst_19 {dimension_numbers = #tpu.dot_dimension_numbers<[1], [0], [0], [1], [0, 0, 1, 1], [], []>} : vector<256x4xf32>, vector<4x128xf32>, vector<256x128xf32> -> vector<256x128xf32>
    %28 = arith.addf %19, %27 : vector<256x128xf32>
    %c1_i32 = arith.constant 1 : i32
    %29 = arith.addi %0, %c1_i32 : i32
    %c0_20 = arith.constant 0 : index
    %30 = arith.index_cast %29 : i32 to index
    %c0_21 = arith.constant 0 : index
    %c0_22 = arith.constant 0 : index
    %31 = vector.load %arg2[%c0_20, %30, %c0_21, %c0_22] : memref<1x18x18x4xf32, #tpu.memory_space<vmem>>, vector<1x16x16x4xf32>
    %32 = vector.shape_cast %31 : vector<1x16x16x4xf32> to vector<16x16x4xf32>
    %33 = vector.shape_cast %32 : vector<16x16x4xf32> to vector<256x4xf32>
    %c3 = arith.constant 3 : index
    %c0_23 = arith.constant 0 : index
    %c0_24 = arith.constant 0 : index
    %34 = vector.load %arg3[%c3, %c0_23, %c0_24] : memref<9x4x128xf32, #tpu.memory_space<vmem>>, vector<1x4x128xf32>
    %35 = vector.shape_cast %34 : vector<1x4x128xf32> to vector<4x128xf32>
    %cst_25 = arith.constant dense<0.000000e+00> : vector<256x128xf32>
    %36 = tpu.matmul %33, %35, %cst_25 {dimension_numbers = #tpu.dot_dimension_numbers<[1], [0], [0], [1], [0, 0, 1, 1], [], []>} : vector<256x4xf32>, vector<4x128xf32>, vector<256x128xf32> -> vector<256x128xf32>
    %37 = arith.addf %28, %36 : vector<256x128xf32>
    %c1_i32_26 = arith.constant 1 : i32
    %38 = arith.addi %0, %c1_i32_26 : i32
    %c0_27 = arith.constant 0 : index
    %39 = arith.index_cast %38 : i32 to index
    %c1_28 = arith.constant 1 : index
    %c0_29 = arith.constant 0 : index
    %40 = vector.load %arg2[%c0_27, %39, %c1_28, %c0_29] : memref<1x18x18x4xf32, #tpu.memory_space<vmem>>, vector<1x16x16x4xf32>
    %41 = vector.shape_cast %40 : vector<1x16x16x4xf32> to vector<16x16x4xf32>
    %42 = vector.shape_cast %41 : vector<16x16x4xf32> to vector<256x4xf32>
    %c4 = arith.constant 4 : index
    %c0_30 = arith.constant 0 : index
    %c0_31 = arith.constant 0 : index
    %43 = vector.load %arg3[%c4, %c0_30, %c0_31] : memref<9x4x128xf32, #tpu.memory_space<vmem>>, vector<1x4x128xf32>
    %44 = vector.shape_cast %43 : vector<1x4x128xf32> to vector<4x128xf32>
    %cst_32 = arith.constant dense<0.000000e+00> : vector<256x128xf32>
    %45 = tpu.matmul %42, %44, %cst_32 {dimension_numbers = #tpu.dot_dimension_numbers<[1], [0], [0], [1], [0, 0, 1, 1], [], []>} : vector<256x4xf32>, vector<4x128xf32>, vector<256x128xf32> -> vector<256x128xf32>
    %46 = arith.addf %37, %45 : vector<256x128xf32>
    %c1_i32_33 = arith.constant 1 : i32
    %47 = arith.addi %0, %c1_i32_33 : i32
    %c0_34 = arith.constant 0 : index
    %48 = arith.index_cast %47 : i32 to index
    %c2_35 = arith.constant 2 : index
    %c0_36 = arith.constant 0 : index
    %49 = vector.load %arg2[%c0_34, %48, %c2_35, %c0_36] : memref<1x18x18x4xf32, #tpu.memory_space<vmem>>, vector<1x16x16x4xf32>
    %50 = vector.shape_cast %49 : vector<1x16x16x4xf32> to vector<16x16x4xf32>
    %51 = vector.shape_cast %50 : vector<16x16x4xf32> to vector<256x4xf32>
    %c5 = arith.constant 5 : index
    %c0_37 = arith.constant 0 : index
    %c0_38 = arith.constant 0 : index
    %52 = vector.load %arg3[%c5, %c0_37, %c0_38] : memref<9x4x128xf32, #tpu.memory_space<vmem>>, vector<1x4x128xf32>
    %53 = vector.shape_cast %52 : vector<1x4x128xf32> to vector<4x128xf32>
    %cst_39 = arith.constant dense<0.000000e+00> : vector<256x128xf32>
    %54 = tpu.matmul %51, %53, %cst_39 {dimension_numbers = #tpu.dot_dimension_numbers<[1], [0], [0], [1], [0, 0, 1, 1], [], []>} : vector<256x4xf32>, vector<4x128xf32>, vector<256x128xf32> -> vector<256x128xf32>
    %55 = arith.addf %46, %54 : vector<256x128xf32>
    %c2_i32 = arith.constant 2 : i32
    %56 = arith.addi %0, %c2_i32 : i32
    %c0_40 = arith.constant 0 : index
    %57 = arith.index_cast %56 : i32 to index
    %c0_41 = arith.constant 0 : index
    %c0_42 = arith.constant 0 : index
    %58 = vector.load %arg2[%c0_40, %57, %c0_41, %c0_42] : memref<1x18x18x4xf32, #tpu.memory_space<vmem>>, vector<1x16x16x4xf32>
    %59 = vector.shape_cast %58 : vector<1x16x16x4xf32> to vector<16x16x4xf32>
    %60 = vector.shape_cast %59 : vector<16x16x4xf32> to vector<256x4xf32>
    %c6 = arith.constant 6 : index
    %c0_43 = arith.constant 0 : index
    %c0_44 = arith.constant 0 : index
    %61 = vector.load %arg3[%c6, %c0_43, %c0_44] : memref<9x4x128xf32, #tpu.memory_space<vmem>>, vector<1x4x128xf32>
    %62 = vector.shape_cast %61 : vector<1x4x128xf32> to vector<4x128xf32>
    %cst_45 = arith.constant dense<0.000000e+00> : vector<256x128xf32>
    %63 = tpu.matmul %60, %62, %cst_45 {dimension_numbers = #tpu.dot_dimension_numbers<[1], [0], [0], [1], [0, 0, 1, 1], [], []>} : vector<256x4xf32>, vector<4x128xf32>, vector<256x128xf32> -> vector<256x128xf32>
    %64 = arith.addf %55, %63 : vector<256x128xf32>
    %c2_i32_46 = arith.constant 2 : i32
    %65 = arith.addi %0, %c2_i32_46 : i32
    %c0_47 = arith.constant 0 : index
    %66 = arith.index_cast %65 : i32 to index
    %c1_48 = arith.constant 1 : index
    %c0_49 = arith.constant 0 : index
    %67 = vector.load %arg2[%c0_47, %66, %c1_48, %c0_49] : memref<1x18x18x4xf32, #tpu.memory_space<vmem>>, vector<1x16x16x4xf32>
    %68 = vector.shape_cast %67 : vector<1x16x16x4xf32> to vector<16x16x4xf32>
    %69 = vector.shape_cast %68 : vector<16x16x4xf32> to vector<256x4xf32>
    %c7 = arith.constant 7 : index
    %c0_50 = arith.constant 0 : index
    %c0_51 = arith.constant 0 : index
    %70 = vector.load %arg3[%c7, %c0_50, %c0_51] : memref<9x4x128xf32, #tpu.memory_space<vmem>>, vector<1x4x128xf32>
    %71 = vector.shape_cast %70 : vector<1x4x128xf32> to vector<4x128xf32>
    %cst_52 = arith.constant dense<0.000000e+00> : vector<256x128xf32>
    %72 = tpu.matmul %69, %71, %cst_52 {dimension_numbers = #tpu.dot_dimension_numbers<[1], [0], [0], [1], [0, 0, 1, 1], [], []>} : vector<256x4xf32>, vector<4x128xf32>, vector<256x128xf32> -> vector<256x128xf32>
    %73 = arith.addf %64, %72 : vector<256x128xf32>
    %c2_i32_53 = arith.constant 2 : i32
    %74 = arith.addi %0, %c2_i32_53 : i32
    %c0_54 = arith.constant 0 : index
    %75 = arith.index_cast %74 : i32 to index
    %c2_55 = arith.constant 2 : index
    %c0_56 = arith.constant 0 : index
    %76 = vector.load %arg2[%c0_54, %75, %c2_55, %c0_56] : memref<1x18x18x4xf32, #tpu.memory_space<vmem>>, vector<1x16x16x4xf32>
    %77 = vector.shape_cast %76 : vector<1x16x16x4xf32> to vector<16x16x4xf32>
    %78 = vector.shape_cast %77 : vector<16x16x4xf32> to vector<256x4xf32>
    %c8 = arith.constant 8 : index
    %c0_57 = arith.constant 0 : index
    %c0_58 = arith.constant 0 : index
    %79 = vector.load %arg3[%c8, %c0_57, %c0_58] : memref<9x4x128xf32, #tpu.memory_space<vmem>>, vector<1x4x128xf32>
    %80 = vector.shape_cast %79 : vector<1x4x128xf32> to vector<4x128xf32>
    %cst_59 = arith.constant dense<0.000000e+00> : vector<256x128xf32>
    %81 = tpu.matmul %78, %80, %cst_59 {dimension_numbers = #tpu.dot_dimension_numbers<[1], [0], [0], [1], [0, 0, 1, 1], [], []>} : vector<256x4xf32>, vector<4x128xf32>, vector<256x128xf32> -> vector<256x128xf32>
    %82 = arith.addf %73, %81 : vector<256x128xf32>
    %c0_60 = arith.constant 0 : index
    %c0_61 = arith.constant 0 : index
    %83 = vector.load %arg4[%c0_60, %c0_61] : memref<1x128xf32, #tpu.memory_space<vmem>>, vector<1x128xf32>
    %84 = vector.broadcast %83 : vector<1x128xf32> to vector<256x128xf32>
    %85 = arith.addf %82, %84 : vector<256x128xf32>
    %cst_62 = arith.constant 0.000000e+00 : f32
    %86 = vector.broadcast %cst_62 : f32 to vector<256x128xf32>
    %87 = arith.maximumf %85, %86 : vector<256x128xf32>
    %c0_63 = arith.constant 0 : index
    %c0_64 = arith.constant 0 : index
    %c0_65 = arith.constant 0 : index
    %88 = vector.load %arg5[%c0_63, %c0_64, %c0_65] : memref<1x256x128xf32, #tpu.memory_space<vmem>>, vector<1x256x128xf32>
    %89 = vector.shape_cast %88 : vector<1x256x128xf32> to vector<256x128xf32>
    %90 = vector.shape_cast %87 : vector<256x128xf32> to vector<1x256x128xf32>
    tpu.vector_store %arg5[%c0_63, %c0_64, %c0_65], %90 {strides = array<i32>} : memref<1x256x128xf32, #tpu.memory_space<vmem>>, vector<1x256x128xf32>,
    return
  }
  func.func @transform_0(%arg0: i32, %arg1: i32) -> (i32, i32, i32, i32) {
    %c0_i32 = arith.constant 0 : i32
    %c0_i32_0 = arith.constant 0 : i32
    %c0_i32_1 = arith.constant 0 : i32
    %c0_i32_2 = arith.constant 0 : i32
    return %arg0, %c0_i32, %c0_i32_0, %c0_i32_1 : i32, i32, i32, i32
  }
  func.func @transform_1(%arg0: i32, %arg1: i32) -> (i32, i32, i32) {
    %c0_i32 = arith.constant 0 : i32
    %c0_i32_0 = arith.constant 0 : i32
    %c0_i32_1 = arith.constant 0 : i32
    %c0_i32_2 = arith.constant 0 : i32
    return %c0_i32, %c0_i32_0, %c0_i32_1 : i32, i32, i32
  }
  func.func @transform_2(%arg0: i32, %arg1: i32) -> (i32, i32) {
    %c0_i32 = arith.constant 0 : i32
    %c0_i32_0 = arith.constant 0 : i32
    %c0_i32_1 = arith.constant 0 : i32
    return %c0_i32, %c0_i32_0 : i32, i32
  }
  func.func @transform_3(%arg0: i32, %arg1: i32) -> (i32, i32, i32) {
    %c0_i32 = arith.constant 0 : i32
    %c0_i32_0 = arith.constant 0 : i32
    return %arg0, %arg1, %c0_i32 : i32, i32, i32
  }
}

module attributes {stable_mosaic.version = 11 : i64} {
  func.func @kernel(%arg0: i32, %arg1: memref<1x48x192xf32, #tpu.memory_space<vmem>>, %arg2: memref<32x48xf32, #tpu.memory_space<vmem>>, %arg3: memref<192x128xf32, #tpu.memory_space<vmem>>, %arg4: memref<1x32x128xf32, #tpu.memory_space<vmem>>) attributes {dimension_semantics = [#tpu.dimension_semantics<parallel>], iteration_bounds = array<i64: 2>, scalar_prefetch = 0 : i64, scratch_operands = 0 : i64, tpu.core_type = #tpu.core_type<tc>, window_params = [{transform_indices = @transform_0, window_bounds = array<i64: 1, 48, 192>}, {pipeline_mode = #tpu.pipeline_mode<synchronous>, transform_indices = @transform_1, window_bounds = array<i64: 32, 48>}, {pipeline_mode = #tpu.pipeline_mode<synchronous>, transform_indices = @transform_2, window_bounds = array<i64: 192, 128>}, {transform_indices = @transform_3, window_bounds = array<i64: 1, 32, 128>}]} {
    %c0 = arith.constant 0 : index
    %c0_0 = arith.constant 0 : index
    %0 = vector.load %arg2[%c0, %c0_0] : memref<32x48xf32, #tpu.memory_space<vmem>>, vector<32x48xf32>
    %c0_1 = arith.constant 0 : index
    %c0_2 = arith.constant 0 : index
    %c0_3 = arith.constant 0 : index
    %1 = vector.load %arg1[%c0_1, %c0_2, %c0_3] : memref<1x48x192xf32, #tpu.memory_space<vmem>>, vector<1x48x192xf32>
    %2 = vector.shape_cast %1 : vector<1x48x192xf32> to vector<48x192xf32>
    %cst = arith.constant dense<0.000000e+00> : vector<32x192xf32>
    %3 = tpu.matmul %0, %2, %cst {dimension_numbers = #tpu.dot_dimension_numbers<[1], [0], [0], [1], [0, 0, 1, 1], [], []>} : vector<32x48xf32>, vector<48x192xf32>, vector<32x192xf32> -> vector<32x192xf32>
    %c0_4 = arith.constant 0 : index
    %c0_5 = arith.constant 0 : index
    %4 = vector.load %arg3[%c0_4, %c0_5] : memref<192x128xf32, #tpu.memory_space<vmem>>, vector<192x128xf32>
    %cst_6 = arith.constant dense<0.000000e+00> : vector<32x128xf32>
    %5 = tpu.matmul %3, %4, %cst_6 {dimension_numbers = #tpu.dot_dimension_numbers<[1], [0], [0], [1], [0, 0, 1, 1], [], []>} : vector<32x192xf32>, vector<192x128xf32>, vector<32x128xf32> -> vector<32x128xf32>
    %cst_7 = arith.constant 0.000000e+00 : f32
    %6 = vector.broadcast %cst_7 : f32 to vector<32x128xf32>
    %7 = arith.maximumf %5, %6 : vector<32x128xf32>
    %c0_8 = arith.constant 0 : index
    %c0_9 = arith.constant 0 : index
    %c0_10 = arith.constant 0 : index
    %8 = vector.load %arg4[%c0_8, %c0_9, %c0_10] : memref<1x32x128xf32, #tpu.memory_space<vmem>>, vector<1x32x128xf32>
    %9 = vector.shape_cast %8 : vector<1x32x128xf32> to vector<32x128xf32>
    %10 = vector.shape_cast %7 : vector<32x128xf32> to vector<1x32x128xf32>
    tpu.vector_store %arg4[%c0_8, %c0_9, %c0_10], %10 {strides = array<i32>} : memref<1x32x128xf32, #tpu.memory_space<vmem>>, vector<1x32x128xf32>,
    return
  }
  func.func @transform_0(%arg0: i32) -> (i32, i32, i32) {
    %c0_i32 = arith.constant 0 : i32
    %c0_i32_0 = arith.constant 0 : i32
    %c0_i32_1 = arith.constant 0 : i32
    return %arg0, %c0_i32, %c0_i32_0 : i32, i32, i32
  }
  func.func @transform_1(%arg0: i32) -> (i32, i32) {
    %c0_i32 = arith.constant 0 : i32
    %c0_i32_0 = arith.constant 0 : i32
    %c0_i32_1 = arith.constant 0 : i32
    return %c0_i32, %c0_i32_0 : i32, i32
  }
  func.func @transform_2(%arg0: i32) -> (i32, i32) {
    %c0_i32 = arith.constant 0 : i32
    %c0_i32_0 = arith.constant 0 : i32
    %c0_i32_1 = arith.constant 0 : i32
    return %c0_i32, %c0_i32_0 : i32, i32
  }
  func.func @transform_3(%arg0: i32) -> (i32, i32, i32) {
    %c0_i32 = arith.constant 0 : i32
    %c0_i32_0 = arith.constant 0 : i32
    %c0_i32_1 = arith.constant 0 : i32
    return %arg0, %c0_i32, %c0_i32_0 : i32, i32, i32
  }
}

</mosaic_0001>

<bundles_post_ra>
// kernel: upsample_block_forward.3
= control target key start
LH: loop header
LB: loop body
LE: loop exit
PB: predicated region body
PF: predicated region fallthrough
CT: control target
= control target key end

     0   :  { %s582_s12 = smov 0   ;;  %s707_s0 = inlined_call_operand.vmem [shape: f32[2,48,192], index: 0, kind: input, shape index: {}]   ;;  %s708_s1 = inlined_call_operand.vmem [shape: f32[32,48], index: 1, kind: input, shape index: {}]   ;;  %s709_s2 = inlined_call_operand.vmem [shape: f32[192,128], index: 2, kind: input, shape index: {}]   ;;  %s710_s3 = inlined_call_operand.vmem [shape: f32[2,32,128], index: 3, kind: output, shape index: {}]  }
   0x1 LB: > { %s474_s13 = sadd.s32 4294967295, %s558_s12   ;;  %p478_p0 = scmp.ge.s32.totalorder %s558_s12, 1  ;;  %s558_s12 = sphi %s582_s12, %s13_s12  }
   0x2   : > { %p137_p1 = scmp.lt.s32.totalorder %s558_s12, 3 }
   0x4   : > { %p138_p2 = pnand %p478_p0, %p137_p1 }
   0x5   : > { %p161_p3 = scmp.lt.s32.totalorder (!%p138_p2), %s474_s13, 1  ;;  %v560_v0 = vmov (!%p138_p2), 0.0   ;;  %v289_v1 = vld [vmem:[%s709_s2] sm:$0xff] (!%p138_p2)  ;;  %v290_v2 = vld [vmem:[%s709_s2 + $0x8] sm:$0xff] (!%p138_p2)  ;;  %v561_v3 = vmov (!%p138_p2), 0.0|0.0   ;;  %v291_v5 = vld [vmem:[%s709_s2 + $0x10] sm:$0xff] (!%p138_p2) }
   0x6   : > { %141 = sbr.rel (%p138_p2) target bundleno = 473 (0x1d9), region = 32  ;;  %264 = vmatprep.mubr.f32.mxu0 (!%p138_p2), %v560_v0  ;;  %505 = vmatprep.subr.bf16.mxu1 (!%p138_p2), %v561_v3  ;;  %v506_v4 = vpack.c.bf16 (!%p138_p2), %v290_v2, %v289_v1  ;;  %v292_v6 = vld [vmem:[%s709_s2 + $0x18] sm:$0xff] (!%p138_p2)  ;;  %v293_v8 = vld [vmem:[%s709_s2 + $0x20] sm:$0xff] (!%p138_p2)  ;;  %v294_v9 = vld [vmem:[%s709_s2 + $0x28] sm:$0xff] (!%p138_p2)  ;;  %vm187_vm0 = vcmask (!%p138_p2), 392192   ;;  %vm313_vm1 = vcmask (!%p138_p2), 523264  }
   0x7   : > { %v509_v7 = vpack.c.bf16 (!%p138_p2), %v292_v6, %v291_v5  ;;  %v295_v13 = vld [vmem:[%s709_s2 + $0x30] sm:$0xff] (!%p138_p2)  ;;  %v296_v14 = vld [vmem:[%s709_s2 + $0x38] sm:$0xff] (!%p138_p2)  ;;  %v512_v19 = vpack.c.bf16 (!%p138_p2), %v294_v9, %v293_v8  ;;  %v297_v31 = vld [vmem:[%s709_s2 + $0x40] sm:$0xff] (!%p138_p2) }
   0x8   : > { %507 = vmatpush1.bf16.msra.mxu1 (!%p138_p2), %v506_v4  ;;  %v515_v30 = vpack.c.bf16 (!%p138_p2), %v296_v14, %v295_v13  ;;  %v298_v32 = vld [vmem:[%s709_s2 + $0x48] sm:$0xff] (!%p138_p2)  ;;  %v299_v35 = vld [vmem:[%s709_s2 + $0x50] sm:$0xff] (!%p138_p2)  ;;  %v300_v36 = vld [vmem:[%s709_s2 + $0x58] sm:$0xff] (!%p138_p2) }
   0x9   : > { %508 = vmatprep.subr.bf16.mxu1 (!%p138_p2), %v561_v3  ;;  %v518_v34 = vpack.c.bf16 (!%p138_p2), %v298_v32, %v297_v31  ;;  %v171_v37 = vld [vmem:[%s708_s1] sm:$0xff] (!%p138_p2)  ;;  %v521_v38 = vpack.c.bf16 (!%p138_p2), %v300_v36, %v299_v35  ;;  %v302_v40 = vld [vmem:[%s709_s2 + $0x68] sm:$0xff] (!%p138_p2)  ;;  %v303_v43 = vld [vmem:[%s709_s2 + $0x70] sm:$0xff] (!%p138_p2) }
   0xa   : > { %v301_v39 = vld [vmem:[%s709_s2 + $0x60] sm:$0xff] (!%p138_p2)  ;;  %v172_v41 = vld [vmem:[%s708_s1 + $0x8] sm:$0xff] (!%p138_p2)  ;;  %v304_v44 = vld [vmem:[%s709_s2 + $0x78] sm:$0xff] (!%p138_p2) }
   0xb   : > { %v524_v42 = vpack.c.bf16 (!%p138_p2), %v302_v40, %v301_v39  ;;  %v173_v45 = vld [vmem:[%s708_s1 + $0x10] sm:$0xff] (!%p138_p2)  ;;  %v527_v46 = vpack.c.bf16 (!%p138_p2), %v304_v44, %v303_v43  ;;  %v305_v47 = vld [vmem:[%s709_s2 + $0x80] sm:$0xff] (!%p138_p2)  ;;  %v306_v48 = vld [vmem:[%s709_s2 + $0x88] sm:$0xff] (!%p138_p2) }
   0xc   : > { %510 = vmatpush1.bf16.msra.mxu1 (!%p138_p2), %v509_v7  ;;  %v174_v49 = vld [vmem:[%s708_s1 + $0x18] sm:$0xff] (!%p138_p2)  ;;  %v530_v50 = vpack.c.bf16 (!%p138_p2), %v306_v48, %v305_v47  ;;  %v307_v51 = vld [vmem:[%s709_s2 + $0x90] sm:$0xff] (!%p138_p2)  ;;  %v309_v54 = vld [vmem:[%s709_s2 + $0xa0] sm:$0xff] (!%p138_p2) }
   0xd   : > { %s712_s13 = smov (!%p161_p3, %s474_s13), 1  ;;  %511 = vmatprep.subr.bf16.mxu1 %v561_v3  ;;  %v308_v52 = vld [vmem:[%s709_s2 + $0x98] sm:$0xff]  ;;  %v310_v55 = vld [vmem:[%s709_s2 + $0xa8] sm:$0xff]  ;;  %v311_v57 = vld [vmem:[%s709_s2 + $0xb0] sm:$0xff] }
   0xe   : > { %s541_s22 = smul.u32 96, %s712_s13  ;;  %v533_v53 = vpack.c.bf16 %v308_v52, %v307_v51  ;;  %v536_v56 = vpack.c.bf16 %v310_v55, %v309_v54  ;;  %v312_v58 = vld [vmem:[%s709_s2 + $0xb8] sm:$0xff]  ;;  %s492_s24 = sshll.u32 %s712_s13, 5 }
   0xf   : > { %v539_v59 = vpack.c.bf16 %v312_v58, %v311_v57  ;;  %s170_s27 = scalar_lea.vmem %s710_s3, %s492_s24 }
  0x10   : > { %s165_s29 = scalar_lea.vmem %s707_s0, %s541_s22  ;;  %513 = vmatpush1.bf16.msra.mxu1 %v512_v19 }
  0x11   : > { %v176_v10 = vld [vmem:[%s165_s29 + $0x8] sm:$0xff]  ;;  %v178_v11 = vld [vmem:[%s165_s29 + $0x18] sm:$0xff]  ;;  %v175_v12 = vld [vmem:[%s165_s29] sm:$0xff]  ;;  %514 = vmatprep.subr.bf16.mxu1 %v561_v3 }
  0x12   : > { %v493_v15 = vpack.c.bf16 %v178_v11, %v176_v10  ;;  %v177_v16 = vld [vmem:[%s165_s29 + $0x10] sm:$0xff]  ;;  %v180_v17 = vld [vmem:[%s165_s29 + $0x28] sm:$0xff]  ;;  %v182_v18 = vld [vmem:[%s165_s29 + $0x38] sm:$0xff] }
  0x13   : > { %v495_v20 = vpack.c.bf16 %v177_v16, %v175_v12  ;;  %v497_v21 = vpack.c.bf16 %v182_v18, %v180_v17  ;;  %v179_v22 = vld [vmem:[%s165_s29 + $0x20] sm:$0xff]  ;;  %v181_v23 = vld [vmem:[%s165_s29 + $0x30] sm:$0xff]  ;;  %v184_v24 = vld [vmem:[%s165_s29 + $0x48] sm:$0xff] }
  0x14   : > { %494 = vmatprep.subr.bf16.mxu0 %v493_v15  ;;  %v186_v25 = vld [vmem:[%s165_s29 + $0x58] sm:$0xff]  ;;  %v499_v26 = vpack.c.bf16 %v181_v23, %v179_v22  ;;  %v183_v28 = vld [vmem:[%s165_s29 + $0x40] sm:$0xff]  ;;  %v185_v29 = vld [vmem:[%s165_s29 + $0x50] sm:$0xff]  ;;  %516 = vmatpush1.bf16.msra.mxu1 %v515_v30 }
  0x15   : > { %496 = vmatpush1.bf16.msra.mxu0 %v495_v20  ;;  %v501_v27 = vpack.c.bf16 %v186_v25, %v184_v24  ;;  %v503_v33 = vpack.c.bf16 %v185_v29, %v183_v28  ;;  %517 = vmatprep.subr.bf16.mxu1 %v561_v3 }
  0x16   : > { %498 = vmatprep.subr.bf16.mxu0 %v497_v21 }
  0x18   : > { %519 = vmatpush1.bf16.msra.mxu1 %v518_v34 }
  0x19   : > { %500 = vmatpush1.bf16.msra.mxu0 %v499_v26  ;;  %520 = vmatprep.subr.bf16.mxu1 %v561_v3 }
  0x1a   : > { %502 = vmatprep.subr.bf16.mxu0 %v501_v27 }
  0x1c   : > { %522 = vmatpush1.bf16.msra.mxu1 %v521_v38 }
  0x1d   : > { %504 = vmatpush1.bf16.msra.mxu0 %v503_v33  ;;  %523 = vmatprep.subr.bf16.mxu1 %v561_v3 }
  0x20   : > { %482 = vmatmul.mubr.msk.f32.vlgmr.msra.gmra.mrb[0].mxu0 %vm187_vm0, %v171_v37  ;;  %525 = vmatpush1.bf16.msra.mxu1 %v524_v42 }
  0x21   : > { %270 = vmatprep.mubr.f32.mxu0 %v560_v0  ;;  %526 = vmatprep.subr.bf16.mxu1 %v561_v3 }
  0x24   : > { %483 = vmatmul.mubr.msk.f32.gmra.mrb[2].mxu0 %vm187_vm0, %v172_v41  ;;  %528 = vmatpush1.bf16.msra.mxu1 %v527_v46 }
  0x25   : > { %276 = vmatprep.mubr.f32.mxu0 %v560_v0  ;;  %529 = vmatprep.subr.bf16.mxu1 %v561_v3 }
  0x28   : > { %484 = vmatmul.mubr.msk.f32.gmra.mrb[4].mxu0 %vm187_vm0, %v173_v45  ;;  %531 = vmatpush1.bf16.msra.mxu1 %v530_v50 }
  0x29   : > { %282 = vmatprep.mubr.f32.mxu0 %v560_v0  ;;  %532 = vmatprep.subr.bf16.mxu1 %v561_v3 }
  0x2c   : > { %485 = vmatmul.mubr.msk.f32.gmra.mrb[6].mxu0 %vm187_vm0, %v174_v49  ;;  %534 = vmatpush1.bf16.msra.mxu1 %v533_v53 }
  0x2d   : > { %535 = vmatprep.subr.bf16.mxu1 %v561_v3 }
  0x30   : > { %537 = vmatpush1.bf16.msra.mxu1 %v536_v56 }
  0x31   : > { %538 = vmatprep.subr.bf16.mxu1 %v561_v3 }
  0x34   : > { %540 = vmatpush1.bf16.msra.mxu1 %v539_v59 }
  0xf3   : > { %v266_v60 = vpop.f32.mrb[0].mxu0 }
  0xf4   : > { %v268_v61 = vpop.f32.mrb[1].mxu0 }
  0xf5   : > { %486 = vmatprep.mubr.msk.f32.mxu1 %vm313_vm1, %v268_v61 }
  0xf6   : > { %391 = vmatmul.mubr.f32.vlgmr.msra.gmra.mrb[0].mxu1 %v266_v60 }
  0xf7   : > { %v272_v62 = vpop.f32.mrb[2].mxu0 }
  0xf8   : > { %v274_v63 = vpop.f32.mrb[3].mxu0 }
  0xf9   : > { %487 = vmatprep.mubr.msk.f32.mxu1 %vm313_vm1, %v274_v63 }
  0xfa   : > { %396 = vmatmul.mubr.f32.gmra.mrb[2].mxu1 %v272_v62 }
  0xfb   : > { %v278_v0 = vpop.f32.mrb[4].mxu0 }
  0xfc   : > { %v280_v1 = vpop.f32.mrb[5].mxu0 }
  0xfd   : > { %488 = vmatprep.mubr.msk.f32.mxu1 %vm313_vm1, %v280_v1 }
  0xfe   : > { %401 = vmatmul.mubr.f32.gmra.mrb[4].mxu1 %v278_v0 }
  0xff   : > { %v284_v2 = vpop.f32.mrb[6].mxu0 }
 0x100   : > { %v286_v3 = vpop.f32.mrb[7].mxu0 }
 0x101   : > { %489 = vmatprep.mubr.msk.f32.mxu1 %vm313_vm1, %v286_v3 }
 0x102   : > { %406 = vmatmul.mubr.f32.gmra.mrb[6].mxu1 %v284_v2 }
 0x1c9   : > { %v392_v4 = vpop.f32.mrb[0].mxu1 }
 0x1ca   : > { %v411_v5 = vmax.f32 %v392_v4, 0.0  ;;  %v394_v6 = vpop.f32.mrb[1].mxu1 }
 0x1cc   : > { %415 = vst [vmem:[%s170_s27] sm:$0xff] %v411_v5 }
 0x1cd   : > { %v397_v7 = vpop.f32.mrb[2].mxu1 }
 0x1ce   : > { %v412_v8 = vmax.f32 %v397_v7, 0.0  ;;  %v399_v9 = vpop.f32.mrb[3].mxu1 }
 0x1d0   : > { %416 = vst [vmem:[%s170_s27 + $0x8] sm:$0xff] %v412_v8 }
 0x1d1   : > { %v402_v10 = vpop.f32.mrb[4].mxu1 }
 0x1d2   : > { %v413_v11 = vmax.f32 %v402_v10, 0.0  ;;  %v404_v12 = vpop.f32.mrb[5].mxu1 }
 0x1d4   : > { %417 = vst [vmem:[%s170_s27 + $0x10] sm:$0xff] %v413_v11 }
 0x1d5   : > { %v407_v13 = vpop.f32.mrb[6].mxu1 }
 0x1d6   : > { %v414_v14 = vmax.f32 %v407_v13, 0.0  ;;  %v409_v15 = vpop.f32.mrb[7].mxu1 }
 0x1d8   : > { %418 = vst [vmem:[%s170_s27 + $0x18] sm:$0xff] %v414_v14 }
 0x1d9 PF: > { %s13_s12 = sadd.s32 1, %s558_s12  }
 0x1da   : > { %p10_p4 = scmp.ge.s32.totalorder %s13_s12, 4  }
 0x1dc   :  { %12 = sbr.rel (!%p10_p4) target bundleno = 1 (0x1), region = 62 }

// kernel: upsample_block_forward.2
= control target key start
LH: loop header
LB: loop body
LE: loop exit
PB: predicated region body
PF: predicated region fallthrough
CT: control target
= control target key end

     0   :  { %s5427_s12 = smov 0   ;;  %s5429_s13 = smov 0   ;;  %s6474_s0 = inlined_call_operand.vmem [shape: f32[2,18,18,4], index: 0, kind: input, shape index: {}]   ;;  %s6475_s1 = inlined_call_operand.vmem [shape: f32[9,4,128], index: 1, kind: input, shape index: {}]   ;;  %s6476_s2 = inlined_call_operand.vmem [shape: f32[1,128], index: 2, kind: input, shape index: {}]   ;;  %s6477_s3 = inlined_call_operand.vmem [shape: f32[2,256,128], index: 3, kind: output, shape index: {}]  }
   0x1   :  { %s5431_s14 = smov 0  }
   0x2 LB: > { %s25_s15 = sadd.s32 1, %s5401_s13  ;;  %p3848_p0 = scmp.ge.s32.totalorder %s5405_s14, 1  ;;  %s5405_s14 = sphi %s5431_s14, %s13_s14   ;;  %s5401_s13 = sphi %s5429_s13, %s6588_s13   ;;  %s5397_s12 = sphi %s5427_s12, %s6587_s12  }
   0x3   : > { %p27_p1 = scmp.ge.s32.totalorder %s25_s15, 2  ;;  %p151_p2 = scmp.lt.s32.totalorder %s5405_s14, 3 }
   0x5   : > { %s6590_s15 = smov (%p27_p1, %s25_s15), 0  ;;  %p152_p3 = pnand %p3848_p0, %p151_p2 }
   0x7   : > { %155 = sbr.rel (%p152_p3) target bundleno = 526 (0x20e), region = 32 }
   0xe   : > { %v3852_v0 = vld [vmem:[%s6475_s1 + $0x4] sm:$0xf]  ;;  %vm361_vm0 = vcmask 1043456   ;;  %v5451_v1 = vld [vmem:[%s6475_s1 + $0x10] sm:$0xf]  ;;  %p179_p4 = scmp.lt.s32.totalorder %s5397_s12, 1 }
   0xf   : > { %4650 = vmatprep.subr.msk.mxu1 %vm361_vm0, %v3852_v0  ;;  %4850 = vmatprep.subr.msk.mxu0 %vm361_vm0, %v5451_v1  ;;  %v229_v2 = vld [vmem:[%s6475_s1] sm:$0xf]  ;;  %v4117_v3 = vld [vmem:[%s6475_s1 + $0x14] sm:$0xf]  ;;  %vm264_vm1 = vcmask 31744  }
  0x10   : > { %4651 = vmatpush3.msk.msra.mxu1 %vm361_vm0, %v3852_v0  ;;  %4851 = vmatpush3.msk.msra.mxu0 %vm361_vm0, %v5451_v1  ;;  %s6592_s12 = smov (!%p179_p4, %s5397_s12), 1  ;;  %v4183_v9 = vld [vmem:[%s6475_s1 + $0x18] sm:$0xf]  ;;  %v5492_v10 = vld [vmem:[%s6475_s1 + $0x8] sm:$0xf] }
  0x11   : > { %4700 = vmatprep.subr.msk.mxu1 %vm361_vm0, %v229_v2  ;;  %4900 = vmatprep.subr.msk.mxu0 %vm361_vm0, %v4117_v3  ;;  %s5358_s24 = smul.u32 432, %s6592_s12  ;;  %v5611_v28 = vld [vmem:[%s6475_s1 + $0x1c] sm:$0xf]  ;;  %v5774_v61 = vld [vmem:[%s6475_s1 + $0xc] sm:$0xf]  ;;  %s4352_s17 = sshll.u32 %s6592_s12, 8 }
  0x12   : > { %s6396_s20 = scalar_lea.vmem %s6477_s3, %s4352_s17 }
  0x13   : > { %s5473_s27 = scalar_lea.vmem %s6474_s0, %s5358_s24 }
  0x14   : > { %v230_v4 = vld [vmem:[%s5473_s27 + $0x1] sm:$0xff]  ;;  %v4019_v5 = vld [vmem:[%s5473_s27 + $0x19] sm:$0xff]  ;;  %v231_v6 = vld [vmem:[%s5473_s27 + $0x9] sm:$0xff] }
  0x15   : > { %4652 = vmatprep.mubr.msk.f32.mxu1 %vm264_vm1, %v230_v4  ;;  %4852 = vmatprep.mubr.msk.f32.mxu0 %vm264_vm1, %v4019_v5  ;;  %v4020_v7 = vld [vmem:[%s5473_s27 + $0x21] sm:$0xff]  ;;  %v5482_v8 = vld [vmem:[%s5473_s27 + $0x31] sm:$0xff]  ;;  %v5497_v11 = vld [vmem:[%s5473_s27 + $0x39] sm:$0xff] }
  0x16   : > { %4653 = vmatmul.mubr.msk.f32.vlgmr.msra.gmra.mrb[0].mxu1 %vm264_vm1, %v231_v6  ;;  %4853 = vmatmul.mubr.msk.f32.vlgmr.msra.gmra.mrb[0].mxu0 %vm264_vm1, %v4020_v7  ;;  %v5503_v12 = vld [vmem:[%s5473_s27 + $0x49] sm:$0xff]  ;;  %v5516_v13 = vld [vmem:[%s5473_s27 + $0x51] sm:$0xff]  ;;  %v5519_v14 = vld [vmem:[%s5473_s27 + $0x61] sm:$0xff] }
  0x17   : > { %4701 = vmatpush3.msk.msra.mxu1 %vm361_vm0, %v229_v2  ;;  %4901 = vmatpush3.msk.msra.mxu0 %vm361_vm0, %v4117_v3  ;;  %v5530_v15 = vld [vmem:[%s5473_s27 + $0x69] sm:$0xff]  ;;  %v5533_v16 = vld [vmem:[%s5473_s27 + $0x79] sm:$0xff]  ;;  %v5544_v17 = vld [vmem:[%s5473_s27 + $0x81] sm:$0xff] }
  0x18   : > { %4655 = vmatprep.mubr.msk.f32.mxu1 %vm264_vm1, %v4019_v5  ;;  %4855 = vmatprep.mubr.msk.f32.mxu0 %vm264_vm1, %v5482_v8  ;;  %v5547_v18 = vld [vmem:[%s5473_s27 + $0x91] sm:$0xff]  ;;  %v5558_v19 = vld [vmem:[%s5473_s27 + $0x99] sm:$0xff]  ;;  %v5561_v20 = vld [vmem:[%s5473_s27 + $0xa9] sm:$0xff] }
  0x19   : > { %4950 = vmatprep.subr.msk.mxu0 %vm361_vm0, %v4183_v9  ;;  %4750 = vmatprep.subr.msk.mxu1 %vm361_vm0, %v5492_v10  ;;  %v5572_v21 = vld [vmem:[%s5473_s27 + $0xb1] sm:$0xff]  ;;  %v5575_v22 = vld [vmem:[%s5473_s27 + $0xc1] sm:$0xff]  ;;  %v5586_v23 = vld [vmem:[%s5473_s27 + $0xc9] sm:$0xff] }
  0x1a   : > { %4656 = vmatmul.mubr.msk.f32.gmra.mrb[2].mxu1 %vm264_vm1, %v4020_v7  ;;  %4856 = vmatmul.mubr.msk.f32.gmra.mrb[2].mxu0 %vm264_vm1, %v5497_v11  ;;  %v5589_v24 = vld [vmem:[%s5473_s27 + $0x1a] sm:$0xff]  ;;  %v5600_v25 = vld [vmem:[%s5473_s27 + $0x22] sm:$0xff]  ;;  %v5606_v27 = vld [vmem:[%s5473_s27 + $0x32] sm:$0xff] }
  0x1b   : > { %4658 = vmatprep.mubr.msk.f32.mxu1 %vm264_vm1, %v5482_v8  ;;  %4858 = vmatprep.mubr.msk.f32.mxu0 %vm264_vm1, %v5503_v12  ;;  %v5603_v26 = vld [vmem:[%s5473_s27 + $0xd9] sm:$0xff]  ;;  %v5621_v29 = vld [vmem:[%s5473_s27 + $0xe1] sm:$0xff]  ;;  %v5629_v31 = vld [vmem:[%s5473_s27 + $0xf1] sm:$0xff] }
  0x1c   : > { %6523 = vst [vmem:[#allocation2_spill] sm:$0xff] %v5621_v29  ;;  %v5624_v30 = vld [vmem:[%s5473_s27 + $0x3a] sm:$0xff]  ;;  %6524 = vst [vmem:[#allocation3_spill] sm:$0xff] %v5629_v31  ;;  %v5632_v32 = vld [vmem:[%s5473_s27 + $0x4a] sm:$0xff] }
  0x1d   : > { %v5645_v33 = vld [vmem:[%s5473_s27 + $0xf9] sm:$0xff]  ;;  %v5651_v35 = vld [vmem:[%s5473_s27 + $0x109] sm:$0xff]  ;;  %v5665_v37 = vld [vmem:[%s5473_s27 + $0x111] sm:$0xff] }
  0x1e   : > { %4659 = vmatmul.mubr.msk.f32.gmra.mrb[4].mxu1 %vm264_vm1, %v5497_v11  ;;  %4859 = vmatmul.mubr.msk.f32.gmra.mrb[4].mxu0 %vm264_vm1, %v5516_v13  ;;  %6525 = vst [vmem:[#allocation4_spill] sm:$0xff] %v5645_v33  ;;  %v5648_v34 = vld [vmem:[%s5473_s27 + $0x52] sm:$0xff]  ;;  %6526 = vst [vmem:[#allocation5_spill] sm:$0xff] %v5651_v35  ;;  %v5654_v36 = vld [vmem:[%s5473_s27 + $0x62] sm:$0xff] }
  0x1f   : > { %4661 = vmatprep.mubr.msk.f32.mxu1 %vm264_vm1, %v5503_v12  ;;  %4861 = vmatprep.mubr.msk.f32.mxu0 %vm264_vm1, %v5519_v14  ;;  %6527 = vst [vmem:[#allocation6_spill] sm:$0xff] %v5665_v37  ;;  %v5668_v38 = vld [vmem:[%s5473_s27 + $0x6a] sm:$0xff]  ;;  %v5671_v39 = vld [vmem:[%s5473_s27 + $0x121] sm:$0xff]  ;;  %v5691_v43 = vld [vmem:[%s5473_s27 + $0x139] sm:$0xff] }
  0x20   : > { %6528 = vst [vmem:[#allocation7_spill] sm:$0xff] %v5671_v39  ;;  %v5674_v40 = vld [vmem:[%s5473_s27 + $0x7a] sm:$0xff]  ;;  %v5685_v41 = vld [vmem:[%s5473_s27 + $0x129] sm:$0xff]  ;;  %6530 = vst [vmem:[#allocation9_spill] sm:$0xff] %v5691_v43 }
  0x21   : > { %6529 = vst [vmem:[#allocation8_spill] sm:$0xff] %v5685_v41  ;;  %v5688_v42 = vld [vmem:[%s5473_s27 + $0x82] sm:$0xff]  ;;  %v5694_v44 = vld [vmem:[%s5473_s27 + $0x92] sm:$0xff]  ;;  %v5708_v46 = vld [vmem:[%s5473_s27 + $0x9a] sm:$0xff] }
  0x22   : > { %4662 = vmatmul.mubr.msk.f32.gmra.mrb[6].mxu1 %vm264_vm1, %v5516_v13  ;;  %4862 = vmatmul.mubr.msk.f32.gmra.mrb[6].mxu0 %vm264_vm1, %v5530_v15  ;;  %v5705_v45 = vld [vmem:[%s5473_s27 + $0x141] sm:$0xff]  ;;  %v5711_v47 = vld [vmem:[%s5473_s27 + $0x151] sm:$0xff]  ;;  %v5725_v49 = vld [vmem:[%s5473_s27 + $0x159] sm:$0xff] }
  0x23   : > { %4664 = vmatprep.mubr.msk.f32.mxu1 %vm264_vm1, %v5519_v14  ;;  %4864 = vmatprep.mubr.msk.f32.mxu0 %vm264_vm1, %v5533_v16  ;;  %6531 = vst [vmem:[#allocation10_spill] sm:$0xff] %v5705_v45  ;;  %6532 = vst [vmem:[#allocation11_spill] sm:$0xff] %v5711_v47  ;;  %v5714_v48 = vld [vmem:[%s5473_s27 + $0xaa] sm:$0xff]  ;;  %v5728_v50 = vld [vmem:[%s5473_s27 + $0xb2] sm:$0xff] }
  0x24   : > { %6533 = vst [vmem:[#allocation12_spill] sm:$0xff] %v5725_v49  ;;  %v5731_v51 = vld [vmem:[%s5473_s27 + $0x169] sm:$0xff]  ;;  %v5745_v53 = vld [vmem:[%s5473_s27 + $0x171] sm:$0xff]  ;;  %v197_v55 = vld [vmem:[%s5473_s27] sm:$0xff] }
  0x25   : > { %6534 = vst [vmem:[#allocation13_spill] sm:$0xff] %v5731_v51  ;;  %v5734_v52 = vld [vmem:[%s5473_s27 + $0xc2] sm:$0xff]  ;;  %6535 = vst [vmem:[#allocation14_spill] sm:$0xff] %v5745_v53  ;;  %v5748_v54 = vld [vmem:[%s5473_s27 + $0xca] sm:$0xff] }
  0x26   : > { %4665 = vmatmul.mubr.msk.f32.gmra.mrb[8].mxu1 %vm264_vm1, %v5530_v15  ;;  %4865 = vmatmul.mubr.msk.f32.gmra.mrb[8].mxu0 %vm264_vm1, %v5544_v17  ;;  %v5752_v56 = vld [vmem:[%s5473_s27 + $0xda] sm:$0xff]  ;;  %v198_v57 = vld [vmem:[%s5473_s27 + $0x8] sm:$0xff]  ;;  %v5769_v60 = vld [vmem:[%s5473_s27 + $0xf2] sm:$0xff] }
  0x27   : > { %4667 = vmatprep.mubr.msk.f32.mxu1 %vm264_vm1, %v5533_v16  ;;  %4867 = vmatprep.mubr.msk.f32.mxu0 %vm264_vm1, %v5547_v18  ;;  %v5763_v58 = vld [vmem:[%s5473_s27 + $0xe2] sm:$0xff]  ;;  %v5766_v59 = vld [vmem:[%s5473_s27 + $0x18] sm:$0xff]  ;;  %v5792_v0 = vld [vmem:[%s5473_s27 + $0x30] sm:$0xff] }
  0x28   : > { %6536 = vst [vmem:[#allocation15_spill] sm:$0xff] %v5766_v59  ;;  %v5784_v62 = vld [vmem:[%s5473_s27 + $0x20] sm:$0xff]  ;;  %6538 = vst [vmem:[#allocation17_spill] sm:$0xff] %v5792_v0  ;;  %v5795_v2 = vld [vmem:[%s5473_s27 + $0x10a] sm:$0xff] }
  0x29   : > { %6537 = vst [vmem:[#allocation16_spill] sm:$0xff] %v5784_v62  ;;  %v5787_v63 = vld [vmem:[%s5473_s27 + $0xfa] sm:$0xff]  ;;  %v5811_v4 = vld [vmem:[%s5473_s27 + $0x112] sm:$0xff]  ;;  %v5814_v5 = vld [vmem:[%s5473_s27 + $0x48] sm:$0xff] }
  0x2a   : > { %4668 = vmatmul.mubr.msk.f32.gmra.mrb[10].mxu1 %vm264_vm1, %v5544_v17  ;;  %4868 = vmatmul.mubr.msk.f32.gmra.mrb[10].mxu0 %vm264_vm1, %v5558_v19  ;;  %v5808_v3 = vld [vmem:[%s5473_s27 + $0x38] sm:$0xff]  ;;  %6540 = vst [vmem:[#allocation19_spill] sm:$0xff] %v5814_v5  ;;  %v5817_v6 = vld [vmem:[%s5473_s27 + $0x122] sm:$0xff]  ;;  %v5828_v7 = vld [vmem:[%s5473_s27 + $0x50] sm:$0xff] }
  0x2b   : > { %4670 = vmatprep.mubr.msk.f32.mxu1 %vm264_vm1, %v5547_v18  ;;  %4870 = vmatprep.mubr.msk.f32.mxu0 %vm264_vm1, %v5561_v20  ;;  %6539 = vst [vmem:[#allocation18_spill] sm:$0xff] %v5808_v3  ;;  %6541 = vst [vmem:[#allocation20_spill] sm:$0xff] %v5828_v7 }
  0x2e   : > { %4671 = vmatmul.mubr.msk.f32.gmra.mrb[12].mxu1 %vm264_vm1, %v5558_v19  ;;  %4871 = vmatmul.mubr.msk.f32.gmra.mrb[12].mxu0 %vm264_vm1, %v5572_v21 }
  0x2f   : > { %4673 = vmatprep.mubr.msk.f32.mxu1 %vm264_vm1, %v5561_v20  ;;  %4873 = vmatprep.mubr.msk.f32.mxu0 %vm264_vm1, %v5575_v22 }
  0x32   : > { %4674 = vmatmul.mubr.msk.f32.gmra.mrb[14].mxu1 %vm264_vm1, %v5572_v21  ;;  %4874 = vmatmul.mubr.msk.f32.gmra.mrb[14].mxu0 %vm264_vm1, %v5586_v23 }
  0x33   : > { %4676 = vmatprep.mubr.msk.f32.mxu1 %vm264_vm1, %v5575_v22  ;;  %4902 = vmatprep.mubr.msk.f32.mxu0 %vm264_vm1, %v5589_v24 }
  0x36   : > { %4677 = vmatmul.mubr.msk.f32.gmra.mrb[16].mxu1 %vm264_vm1, %v5586_v23  ;;  %4903 = vmatmul.mubr.msk.f32.vlgmr.msra.gmra.mrb[0].mxu0 %vm264_vm1, %v5600_v25 }
  0x37   : > { %4951 = vmatpush3.msk.msra.mxu0 %vm361_vm0, %v4183_v9  ;;  %4679 = vmatprep.mubr.msk.f32.mxu1 %vm264_vm1, %v5603_v26  ;;  %v5831_v9 = vld [vmem:[%s5473_s27 + $0x12a] sm:$0xff] }
  0x38   : > { %4905 = vmatprep.mubr.msk.f32.mxu0 %vm264_vm1, %v5606_v27  ;;  %5000 = vmatprep.subr.msk.mxu0 %vm361_vm0, %v5611_v28 }
  0x3a   : > { %4680 = vmatmul.mubr.msk.f32.gmra.mrb[18].mxu1 %vm264_vm1, %v5621_v29  ;;  %4906 = vmatmul.mubr.msk.f32.gmra.mrb[2].mxu0 %vm264_vm1, %v5624_v30  ;;  %v5928_v29 = vld [vmem:[%s5473_s27 + $0xd8] sm:$0xff] }
  0x3b   : > { %4682 = vmatprep.mubr.msk.f32.mxu1 %vm264_vm1, %v5629_v31  ;;  %4908 = vmatprep.mubr.msk.f32.mxu0 %vm264_vm1, %v5632_v32  ;;  %v5911_v31 = vld [vmem:[%s5473_s27 + $0x18a] sm:$0xff] }
  0x3c   : > { %6552 = vst [vmem:[#allocation31_spill] sm:$0xff] %v5911_v31 }
  0x3e   : > { %4683 = vmatmul.mubr.msk.f32.gmra.mrb[20].mxu1 %vm264_vm1, %v5645_v33  ;;  %4909 = vmatmul.mubr.msk.f32.gmra.mrb[4].mxu0 %vm264_vm1, %v5648_v34  ;;  %v5897_v33 = vld [vmem:[%s5473_s27 + $0x182] sm:$0xff] }
  0x3f   : > { %4685 = vmatprep.mubr.msk.f32.mxu1 %vm264_vm1, %v5651_v35  ;;  %4911 = vmatprep.mubr.msk.f32.mxu0 %vm264_vm1, %v5654_v36  ;;  %v5894_v35 = vld [vmem:[%s5473_s27 + $0xa8] sm:$0xff]  ;;  %6550 = vst [vmem:[#allocation29_spill] sm:$0xff] %v5897_v33 }
  0x40   : > { %6549 = vst [vmem:[#allocation28_spill] sm:$0xff] %v5894_v35 }
  0x42   : > { %4686 = vmatmul.mubr.msk.f32.gmra.mrb[22].mxu1 %vm264_vm1, %v5665_v37  ;;  %4912 = vmatmul.mubr.msk.f32.gmra.mrb[6].mxu0 %vm264_vm1, %v5668_v38  ;;  %v5891_v37 = vld [vmem:[%s5473_s27 + $0x172] sm:$0xff] }
  0x43   : > { %4688 = vmatprep.mubr.msk.f32.mxu1 %vm264_vm1, %v5671_v39  ;;  %4914 = vmatprep.mubr.msk.f32.mxu0 %vm264_vm1, %v5674_v40  ;;  %v5888_v39 = vld [vmem:[%s5473_s27 + $0x98] sm:$0xff]  ;;  %6548 = vst [vmem:[#allocation27_spill] sm:$0xff] %v5891_v37 }
  0x44   : > { %6547 = vst [vmem:[#allocation26_spill] sm:$0xff] %v5888_v39 }
  0x46   : > { %4689 = vmatmul.mubr.msk.f32.gmra.mrb[24].mxu1 %vm264_vm1, %v5685_v41  ;;  %4915 = vmatmul.mubr.msk.f32.gmra.mrb[8].mxu0 %vm264_vm1, %v5688_v42  ;;  %v5877_v41 = vld [vmem:[%s5473_s27 + $0x16a] sm:$0xff] }
  0x47   : > { %4691 = vmatprep.mubr.msk.f32.mxu1 %vm264_vm1, %v5691_v43  ;;  %4917 = vmatprep.mubr.msk.f32.mxu0 %vm264_vm1, %v5694_v44  ;;  %v5874_v43 = vld [vmem:[%s5473_s27 + $0x90] sm:$0xff] }
  0x48   : > { %6546 = vst [vmem:[#allocation25_spill] sm:$0xff] %v5874_v43 }
  0x4a   : > { %4692 = vmatmul.mubr.msk.f32.gmra.mrb[26].mxu1 %vm264_vm1, %v5705_v45  ;;  %4918 = vmatmul.mubr.msk.f32.gmra.mrb[10].mxu0 %vm264_vm1, %v5708_v46  ;;  %v5871_v45 = vld [vmem:[%s5473_s27 + $0x15a] sm:$0xff] }
  0x4b   : > { %4694 = vmatprep.mubr.msk.f32.mxu1 %vm264_vm1, %v5711_v47  ;;  %4920 = vmatprep.mubr.msk.f32.mxu0 %vm264_vm1, %v5714_v48  ;;  %v5868_v47 = vld [vmem:[%s5473_s27 + $0x80] sm:$0xff] }
  0x4c   : > { %6545 = vst [vmem:[#allocation24_spill] sm:$0xff] %v5868_v47 }
  0x4e   : > { %4695 = vmatmul.mubr.msk.f32.gmra.mrb[28].mxu1 %vm264_vm1, %v5725_v49  ;;  %4921 = vmatmul.mubr.msk.f32.gmra.mrb[12].mxu0 %vm264_vm1, %v5728_v50  ;;  %v5857_v49 = vld [vmem:[%s5473_s27 + $0x152] sm:$0xff] }
  0x4f   : > { %4697 = vmatprep.mubr.msk.f32.mxu1 %vm264_vm1, %v5731_v51  ;;  %4923 = vmatprep.mubr.msk.f32.mxu0 %vm264_vm1, %v5734_v52  ;;  %v5854_v51 = vld [vmem:[%s5473_s27 + $0x78] sm:$0xff] }
  0x50   : > { %6544 = vst [vmem:[#allocation23_spill] sm:$0xff] %v5854_v51 }
  0x52   : > { %4698 = vmatmul.mubr.msk.f32.gmra.mrb[30].mxu1 %vm264_vm1, %v5745_v53  ;;  %4924 = vmatmul.mubr.msk.f32.gmra.mrb[14].mxu0 %vm264_vm1, %v5748_v54  ;;  %v5851_v53 = vld [vmem:[%s5473_s27 + $0x142] sm:$0xff] }
  0x53   : > { %4702 = vmatprep.mubr.msk.f32.mxu1 %vm264_vm1, %v197_v55  ;;  %4926 = vmatprep.mubr.msk.f32.mxu0 %vm264_vm1, %v5752_v56  ;;  %v5837_v55 = vld [vmem:[%s5473_s27 + $0x13a] sm:$0xff] }
  0x56   : > { %4703 = vmatmul.mubr.msk.f32.vlgmr.msra.gmra.mrb[0].mxu1 %vm264_vm1, %v198_v57  ;;  %4927 = vmatmul.mubr.msk.f32.gmra.mrb[16].mxu0 %vm264_vm1, %v5763_v58  ;;  %v5848_v57 = vld [vmem:[%s5473_s27 + $0x68] sm:$0xff] }
  0x57   : > { %4751 = vmatpush3.msk.msra.mxu1 %vm361_vm0, %v5492_v10  ;;  %4705 = vmatprep.mubr.msk.f32.mxu1 %vm264_vm1, %v5766_v59  ;;  %v5834_v10 = vld [vmem:[%s5473_s27 + $0x60] sm:$0xff]  ;;  %6543 = vst [vmem:[#allocation22_spill] sm:$0xff] %v5848_v57 }
  0x58   : > { %4929 = vmatprep.mubr.msk.f32.mxu0 %vm264_vm1, %v5769_v60  ;;  %4800 = vmatprep.subr.msk.mxu1 %vm361_vm0, %v5774_v61  ;;  %6542 = vst [vmem:[#allocation21_spill] sm:$0xff] %v5834_v10  ;;  %v5914_v59 = vld [vmem:[%s5473_s27 + $0xc0] sm:$0xff] }
  0x5a   : > { %4706 = vmatmul.mubr.msk.f32.gmra.mrb[2].mxu1 %vm264_vm1, %v5784_v62  ;;  %4930 = vmatmul.mubr.msk.f32.gmra.mrb[18].mxu0 %vm264_vm1, %v5787_v63  ;;  %v5908_v62 = vld [vmem:[%s5473_s27 + $0xb0] sm:$0xff] }
  0x5b   : > { %4708 = vmatprep.mubr.msk.f32.mxu1 %vm264_vm1, %v5792_v0  ;;  %4932 = vmatprep.mubr.msk.f32.mxu0 %vm264_vm1, %v5795_v2  ;;  %6551 = vst [vmem:[#allocation30_spill] sm:$0xff] %v5908_v62 }
  0x5e   : > { %4709 = vmatmul.mubr.msk.f32.gmra.mrb[4].mxu1 %vm264_vm1, %v5808_v3  ;;  %4933 = vmatmul.mubr.msk.f32.gmra.mrb[20].mxu0 %vm264_vm1, %v5811_v4 }
  0x5f   : > { %4711 = vmatprep.mubr.msk.f32.mxu1 %vm264_vm1, %v5814_v5  ;;  %4935 = vmatprep.mubr.msk.f32.mxu0 %vm264_vm1, %v5817_v6 }
  0x62   : > { %4712 = vmatmul.mubr.msk.f32.gmra.mrb[6].mxu1 %vm264_vm1, %v5828_v7  ;;  %4936 = vmatmul.mubr.msk.f32.gmra.mrb[22].mxu0 %vm264_vm1, %v5831_v9 }
  0x63   : > { %4714 = vmatprep.mubr.msk.f32.mxu1 %vm264_vm1, %v5834_v10  ;;  %4938 = vmatprep.mubr.msk.f32.mxu0 %vm264_vm1, %v5837_v55 }
  0x66   : > { %4715 = vmatmul.mubr.msk.f32.gmra.mrb[8].mxu1 %vm264_vm1, %v5848_v57  ;;  %4939 = vmatmul.mubr.msk.f32.gmra.mrb[24].mxu0 %vm264_vm1, %v5851_v53 }
  0x67   : > { %4717 = vmatprep.mubr.msk.f32.mxu1 %vm264_vm1, %v5854_v51  ;;  %4941 = vmatprep.mubr.msk.f32.mxu0 %vm264_vm1, %v5857_v49 }
  0x6a   : > { %4718 = vmatmul.mubr.msk.f32.gmra.mrb[10].mxu1 %vm264_vm1, %v5868_v47  ;;  %4942 = vmatmul.mubr.msk.f32.gmra.mrb[26].mxu0 %vm264_vm1, %v5871_v45 }
  0x6b   : > { %4720 = vmatprep.mubr.msk.f32.mxu1 %vm264_vm1, %v5874_v43  ;;  %4944 = vmatprep.mubr.msk.f32.mxu0 %vm264_vm1, %v5877_v41 }
  0x6e   : > { %4721 = vmatmul.mubr.msk.f32.gmra.mrb[12].mxu1 %vm264_vm1, %v5888_v39  ;;  %4945 = vmatmul.mubr.msk.f32.gmra.mrb[28].mxu0 %vm264_vm1, %v5891_v37  ;;  %v5933_v37 = vld [vmem:[%s6475_s1 + $0x20] sm:$0xf] }
  0x6f   : > { %4723 = vmatprep.mubr.msk.f32.mxu1 %vm264_vm1, %v5894_v35  ;;  %4947 = vmatprep.mubr.msk.f32.mxu0 %vm264_vm1, %v5897_v33  ;;  %v5925_v33 = vld [vmem:[%s5473_s27 + $0xc8] sm:$0xff] }
  0x70   : > { %6553 = vst [vmem:[#allocation32_spill] sm:$0xff] %v5925_v33 }
  0x72   : > { %4724 = vmatmul.mubr.msk.f32.gmra.mrb[14].mxu1 %vm264_vm1, %v5908_v62  ;;  %4948 = vmatmul.mubr.msk.f32.gmra.mrb[30].mxu0 %vm264_vm1, %v5911_v31  ;;  %v5944_v31 = vld [vmem:[%s5473_s27 + $0xe0] sm:$0xff] }
  0x73   : > { %4726 = vmatprep.mubr.msk.f32.mxu1 %vm264_vm1, %v5914_v59  ;;  %4952 = vmatprep.mubr.msk.f32.mxu0 %vm264_vm1, %v5792_v0  ;;  %v5949_v0 = vld [vmem:[%s5473_s27 + $0xf0] sm:$0xff] }
  0x76   : > { %4727 = vmatmul.mubr.msk.f32.gmra.mrb[16].mxu1 %vm264_vm1, %v5925_v33  ;;  %4953 = vmatmul.mubr.msk.f32.vlgmr.msra.gmra.mrb[0].mxu0 %vm264_vm1, %v5808_v3  ;;  %v914_v3 = vld [vmem:[%s5473_s27 + $0x2] sm:$0xff] }
  0x77   : > { %5001 = vmatpush3.msk.msra.mxu0 %vm361_vm0, %v5611_v28  ;;  %4729 = vmatprep.mubr.msk.f32.mxu1 %vm264_vm1, %v5928_v29  ;;  %v5962_v28 = vld [vmem:[%s5473_s27 + $0xf8] sm:$0xff] }
  0x78   : > { %4955 = vmatprep.mubr.msk.f32.mxu0 %vm264_vm1, %v5814_v5  ;;  %5050 = vmatprep.subr.msk.mxu0 %vm361_vm0, %v5933_v37  ;;  %v5965_v5 = vld [vmem:[%s5473_s27 + $0x108] sm:$0xff] }
  0x7a   : > { %4730 = vmatmul.mubr.msk.f32.gmra.mrb[18].mxu1 %vm264_vm1, %v5944_v31  ;;  %4956 = vmatmul.mubr.msk.f32.gmra.mrb[2].mxu0 %vm264_vm1, %v5828_v7  ;;  %v5976_v7 = vld [vmem:[%s5473_s27 + $0x110] sm:$0xff] }
  0x7b   : > { %4732 = vmatprep.mubr.msk.f32.mxu1 %vm264_vm1, %v5949_v0  ;;  %4958 = vmatprep.mubr.msk.f32.mxu0 %vm264_vm1, %v5834_v10  ;;  %v5979_v10 = vld [vmem:[%s5473_s27 + $0x120] sm:$0xff] }
  0x7e   : > { %4733 = vmatmul.mubr.msk.f32.gmra.mrb[20].mxu1 %vm264_vm1, %v5962_v28  ;;  %4959 = vmatmul.mubr.msk.f32.gmra.mrb[4].mxu0 %vm264_vm1, %v5848_v57  ;;  %v5990_v57 = vld [vmem:[%s5473_s27 + $0x128] sm:$0xff] }
  0x7f   : > { %4735 = vmatprep.mubr.msk.f32.mxu1 %vm264_vm1, %v5965_v5  ;;  %4961 = vmatprep.mubr.msk.f32.mxu0 %vm264_vm1, %v5854_v51  ;;  %v5993_v51 = vld [vmem:[%s5473_s27 + $0x138] sm:$0xff] }
  0x82   : > { %4736 = vmatmul.mubr.msk.f32.gmra.mrb[22].mxu1 %vm264_vm1, %v5976_v7  ;;  %4962 = vmatmul.mubr.msk.f32.gmra.mrb[6].mxu0 %vm264_vm1, %v5868_v47  ;;  %v6004_v47 = vld [vmem:[%s5473_s27 + $0x140] sm:$0xff] }
  0x83   : > { %4738 = vmatprep.mubr.msk.f32.mxu1 %vm264_vm1, %v5979_v10  ;;  %4964 = vmatprep.mubr.msk.f32.mxu0 %vm264_vm1, %v5874_v43  ;;  %v6007_v43 = vld [vmem:[%s5473_s27 + $0x150] sm:$0xff] }
  0x86   : > { %4739 = vmatmul.mubr.msk.f32.gmra.mrb[24].mxu1 %vm264_vm1, %v5990_v57  ;;  %4965 = vmatmul.mubr.msk.f32.gmra.mrb[8].mxu0 %vm264_vm1, %v5888_v39  ;;  %v6018_v39 = vld [vmem:[%s5473_s27 + $0x158] sm:$0xff] }
  0x87   : > { %4741 = vmatprep.mubr.msk.f32.mxu1 %vm264_vm1, %v5993_v51  ;;  %4967 = vmatprep.mubr.msk.f32.mxu0 %vm264_vm1, %v5894_v35  ;;  %v6021_v35 = vld [vmem:[%s5473_s27 + $0x168] sm:$0xff] }
  0x8a   : > { %4742 = vmatmul.mubr.msk.f32.gmra.mrb[26].mxu1 %vm264_vm1, %v6004_v47  ;;  %4968 = vmatmul.mubr.msk.f32.gmra.mrb[10].mxu0 %vm264_vm1, %v5908_v62  ;;  %v6032_v62 = vld [vmem:[%s5473_s27 + $0x170] sm:$0xff] }
  0x8b   : > { %4744 = vmatprep.mubr.msk.f32.mxu1 %vm264_vm1, %v6007_v43  ;;  %4970 = vmatprep.mubr.msk.f32.mxu0 %vm264_vm1, %v5914_v59 }
  0x8e   : > { %4745 = vmatmul.mubr.msk.f32.gmra.mrb[28].mxu1 %vm264_vm1, %v6018_v39  ;;  %4971 = vmatmul.mubr.msk.f32.gmra.mrb[12].mxu0 %vm264_vm1, %v5925_v33  ;;  %v915_v33 = vld [vmem:[%s5473_s27 + $0xa] sm:$0xff] }
  0x8f   : > { %4747 = vmatprep.mubr.msk.f32.mxu1 %vm264_vm1, %v6021_v35  ;;  %4973 = vmatprep.mubr.msk.f32.mxu0 %vm264_vm1, %v5928_v29 }
  0x92   : > { %4748 = vmatmul.mubr.msk.f32.gmra.mrb[30].mxu1 %vm264_vm1, %v6032_v62  ;;  %4974 = vmatmul.mubr.msk.f32.gmra.mrb[14].mxu0 %vm264_vm1, %v5944_v31 }
  0x93   : > { %4752 = vmatprep.mubr.msk.f32.mxu1 %vm264_vm1, %v914_v3  ;;  %4976 = vmatprep.mubr.msk.f32.mxu0 %vm264_vm1, %v5949_v0  ;;  %v6570_v3 = vld [vmem:[#allocation22_spill] sm:$0xff] }
  0x96   : > { %4753 = vmatmul.mubr.msk.f32.vlgmr.msra.gmra.mrb[0].mxu1 %vm264_vm1, %v915_v33  ;;  %4977 = vmatmul.mubr.msk.f32.gmra.mrb[16].mxu0 %vm264_vm1, %v5962_v28  ;;  %v4181_v33 = vld [vmem:[%s5473_s27 + $0x198] sm:$0xff] }
  0x97   : > { %4801 = vmatpush3.msk.msra.mxu1 %vm361_vm0, %v5774_v61  ;;  %4755 = vmatprep.mubr.msk.f32.mxu1 %vm264_vm1, %v5589_v24  ;;  %v6087_v24 = vld [vmem:[%s5473_s27 + $0x180] sm:$0xff] }
  0x98   : > { %4979 = vmatprep.mubr.msk.f32.mxu0 %vm264_vm1, %v5965_v5  ;;  %5100 = vmatprep.subr.msk.mxu1 %vm361_vm0, %v5451_v1  ;;  %v4182_v61 = vld [vmem:[%s5473_s27 + $0x1a0] sm:$0xff] }
  0x9a   : > { %4756 = vmatmul.mubr.msk.f32.gmra.mrb[2].mxu1 %vm264_vm1, %v5600_v25  ;;  %4980 = vmatmul.mubr.msk.f32.gmra.mrb[18].mxu0 %vm264_vm1, %v5976_v7  ;;  %v6098_v25 = vld [vmem:[%s5473_s27 + $0x188] sm:$0xff] }
  0x9b   : > { %4758 = vmatprep.mubr.msk.f32.mxu1 %vm264_vm1, %v5606_v27  ;;  %4982 = vmatprep.mubr.msk.f32.mxu0 %vm264_vm1, %v5979_v10 }
  0x9e   : > { %4759 = vmatmul.mubr.msk.f32.gmra.mrb[4].mxu1 %vm264_vm1, %v5624_v30  ;;  %4983 = vmatmul.mubr.msk.f32.gmra.mrb[20].mxu0 %vm264_vm1, %v5990_v57 }
  0x9f   : > { %4761 = vmatprep.mubr.msk.f32.mxu1 %vm264_vm1, %v5632_v32  ;;  %4985 = vmatprep.mubr.msk.f32.mxu0 %vm264_vm1, %v5993_v51 }
  0xa2   : > { %4762 = vmatmul.mubr.msk.f32.gmra.mrb[6].mxu1 %vm264_vm1, %v5648_v34  ;;  %4986 = vmatmul.mubr.msk.f32.gmra.mrb[22].mxu0 %vm264_vm1, %v6004_v47 }
  0xa3   : > { %4764 = vmatprep.mubr.msk.f32.mxu1 %vm264_vm1, %v5654_v36  ;;  %4988 = vmatprep.mubr.msk.f32.mxu0 %vm264_vm1, %v6007_v43 }
  0xa6   : > { %4765 = vmatmul.mubr.msk.f32.gmra.mrb[8].mxu1 %vm264_vm1, %v5668_v38  ;;  %4989 = vmatmul.mubr.msk.f32.gmra.mrb[24].mxu0 %vm264_vm1, %v6018_v39 }
  0xa7   : > { %4767 = vmatprep.mubr.msk.f32.mxu1 %vm264_vm1, %v5674_v40  ;;  %4991 = vmatprep.mubr.msk.f32.mxu0 %vm264_vm1, %v6021_v35 }
  0xaa   : > { %4768 = vmatmul.mubr.msk.f32.gmra.mrb[10].mxu1 %vm264_vm1, %v5688_v42  ;;  %4992 = vmatmul.mubr.msk.f32.gmra.mrb[26].mxu0 %vm264_vm1, %v6032_v62 }
  0xab   : > { %4770 = vmatprep.mubr.msk.f32.mxu1 %vm264_vm1, %v5694_v44  ;;  %4994 = vmatprep.mubr.msk.f32.mxu0 %vm264_vm1, %v6087_v24 }
  0xae   : > { %4771 = vmatmul.mubr.msk.f32.gmra.mrb[12].mxu1 %vm264_vm1, %v5708_v46  ;;  %4995 = vmatmul.mubr.msk.f32.gmra.mrb[28].mxu0 %vm264_vm1, %v6098_v25 }
  0xaf   : > { %4773 = vmatprep.mubr.msk.f32.mxu1 %vm264_vm1, %v5714_v48  ;;  %4997 = vmatprep.mubr.msk.f32.mxu0 %vm264_vm1, %v4181_v33  ;;  %v6571_v33 = vld [vmem:[#allocation10_spill] sm:$0xff] }
  0xb2   : > { %4774 = vmatmul.mubr.msk.f32.gmra.mrb[14].mxu1 %vm264_vm1, %v5728_v50  ;;  %4998 = vmatmul.mubr.msk.f32.gmra.mrb[30].mxu0 %vm264_vm1, %v4182_v61  ;;  %v6572_v61 = vld [vmem:[#allocation23_spill] sm:$0xff] }
  0xb3   : > { %4776 = vmatprep.mubr.msk.f32.mxu1 %vm264_vm1, %v5734_v52  ;;  %5002 = vmatprep.mubr.msk.f32.mxu0 %vm264_vm1, %v5482_v8  ;;  %v6554_v8 = vld [vmem:[#allocation27_spill] sm:$0xff] }
  0xb6   : > { %4777 = vmatmul.mubr.msk.f32.gmra.mrb[16].mxu1 %vm264_vm1, %v5748_v54  ;;  %5003 = vmatmul.mubr.msk.f32.vlgmr.msra.gmra.mrb[0].mxu0 %vm264_vm1, %v5497_v11  ;;  %v6555_v11 = vld [vmem:[#allocation2_spill] sm:$0xff] }
  0xb7   : > { %5051 = vmatpush3.msk.msra.mxu0 %vm361_vm0, %v5933_v37  ;;  %4779 = vmatprep.mubr.msk.f32.mxu1 %vm264_vm1, %v5752_v56  ;;  %v6569_v37 = vld [vmem:[#allocation9_spill] sm:$0xff] }
  0xb8   : > { %5005 = vmatprep.mubr.msk.f32.mxu0 %vm264_vm1, %v5503_v12  ;;  %v6556_v12 = vld [vmem:[#allocation15_spill] sm:$0xff] }
  0xba   : > { %4780 = vmatmul.mubr.msk.f32.gmra.mrb[18].mxu1 %vm264_vm1, %v5763_v58  ;;  %5006 = vmatmul.mubr.msk.f32.gmra.mrb[2].mxu0 %vm264_vm1, %v5516_v13  ;;  %v6557_v13 = vld [vmem:[#allocation3_spill] sm:$0xff] }
  0xbb   : > { %4782 = vmatprep.mubr.msk.f32.mxu1 %vm264_vm1, %v5769_v60  ;;  %5008 = vmatprep.mubr.msk.f32.mxu0 %vm264_vm1, %v5519_v14  ;;  %v6558_v14 = vld [vmem:[#allocation16_spill] sm:$0xff] }
  0xbe   : > { %4783 = vmatmul.mubr.msk.f32.gmra.mrb[20].mxu1 %vm264_vm1, %v5787_v63  ;;  %5009 = vmatmul.mubr.msk.f32.gmra.mrb[4].mxu0 %vm264_vm1, %v5530_v15  ;;  %v6559_v15 = vld [vmem:[#allocation4_spill] sm:$0xff] }
  0xbf   : > { %4785 = vmatprep.mubr.msk.f32.mxu1 %vm264_vm1, %v5795_v2  ;;  %5011 = vmatprep.mubr.msk.f32.mxu0 %vm264_vm1, %v5533_v16  ;;  %v6560_v16 = vld [vmem:[#allocation17_spill] sm:$0xff] }
  0xc2   : > { %4786 = vmatmul.mubr.msk.f32.gmra.mrb[22].mxu1 %vm264_vm1, %v5811_v4  ;;  %5012 = vmatmul.mubr.msk.f32.gmra.mrb[6].mxu0 %vm264_vm1, %v5544_v17  ;;  %v6561_v17 = vld [vmem:[#allocation5_spill] sm:$0xff] }
  0xc3   : > { %4788 = vmatprep.mubr.msk.f32.mxu1 %vm264_vm1, %v5817_v6  ;;  %5014 = vmatprep.mubr.msk.f32.mxu0 %vm264_vm1, %v5547_v18  ;;  %v6562_v18 = vld [vmem:[#allocation18_spill] sm:$0xff] }
  0xc6   : > { %4789 = vmatmul.mubr.msk.f32.gmra.mrb[24].mxu1 %vm264_vm1, %v5831_v9  ;;  %5015 = vmatmul.mubr.msk.f32.gmra.mrb[8].mxu0 %vm264_vm1, %v5558_v19  ;;  %v6563_v19 = vld [vmem:[#allocation6_spill] sm:$0xff] }
  0xc7   : > { %4791 = vmatprep.mubr.msk.f32.mxu1 %vm264_vm1, %v5837_v55  ;;  %5017 = vmatprep.mubr.msk.f32.mxu0 %vm264_vm1, %v5561_v20  ;;  %v6564_v20 = vld [vmem:[#allocation19_spill] sm:$0xff] }
  0xca   : > { %4792 = vmatmul.mubr.msk.f32.gmra.mrb[26].mxu1 %vm264_vm1, %v5851_v53  ;;  %5018 = vmatmul.mubr.msk.f32.gmra.mrb[10].mxu0 %vm264_vm1, %v5572_v21  ;;  %v6565_v21 = vld [vmem:[#allocation7_spill] sm:$0xff] }
  0xcb   : > { %4794 = vmatprep.mubr.msk.f32.mxu1 %vm264_vm1, %v5857_v49  ;;  %5020 = vmatprep.mubr.msk.f32.mxu0 %vm264_vm1, %v5575_v22  ;;  %v6567_v22 = vld [vmem:[#allocation8_spill] sm:$0xff] }
  0xce   : > { %4795 = vmatmul.mubr.msk.f32.gmra.mrb[28].mxu1 %vm264_vm1, %v5871_v45  ;;  %5021 = vmatmul.mubr.msk.f32.gmra.mrb[12].mxu0 %vm264_vm1, %v5586_v23  ;;  %v6568_v23 = vld [vmem:[#allocation21_spill] sm:$0xff] }
  0xcf   : > { %4797 = vmatprep.mubr.msk.f32.mxu1 %vm264_vm1, %v5877_v41  ;;  %5023 = vmatprep.mubr.msk.f32.mxu0 %vm264_vm1, %v5603_v26 }
  0xd2   : > { %4798 = vmatmul.mubr.msk.f32.gmra.mrb[30].mxu1 %vm264_vm1, %v6554_v8  ;;  %5024 = vmatmul.mubr.msk.f32.gmra.mrb[14].mxu0 %vm264_vm1, %v6555_v11  ;;  %v6581_v8 = vld [vmem:[#allocation30_spill] sm:$0xff] }
  0xd3   : > { %4802 = vmatprep.mubr.msk.f32.mxu1 %vm264_vm1, %v6556_v12  ;;  %5026 = vmatprep.mubr.msk.f32.mxu0 %vm264_vm1, %v6557_v13  ;;  %v6573_v12 = vld [vmem:[#allocation11_spill] sm:$0xff] }
  0xd6   : > { %4803 = vmatmul.mubr.msk.f32.vlgmr.msra.gmra.mrb[0].mxu1 %vm264_vm1, %v6558_v14  ;;  %5027 = vmatmul.mubr.msk.f32.gmra.mrb[16].mxu0 %vm264_vm1, %v6559_v15  ;;  %v6574_v14 = vld [vmem:[#allocation24_spill] sm:$0xff] }
  0xd7   : > { %5101 = vmatpush3.msk.msra.mxu1 %vm361_vm0, %v5451_v1  ;;  %4805 = vmatprep.mubr.msk.f32.mxu1 %vm264_vm1, %v6560_v16  ;;  %v6566_v1 = vld [vmem:[#allocation20_spill] sm:$0xff] }
  0xd8   : > { %5029 = vmatprep.mubr.msk.f32.mxu0 %vm264_vm1, %v6561_v17  ;;  %v6575_v16 = vld [vmem:[#allocation12_spill] sm:$0xff] }
  0xda   : > { %4806 = vmatmul.mubr.msk.f32.gmra.mrb[2].mxu1 %vm264_vm1, %v6562_v18  ;;  %5030 = vmatmul.mubr.msk.f32.gmra.mrb[18].mxu0 %vm264_vm1, %v6563_v19  ;;  %v6576_v18 = vld [vmem:[#allocation25_spill] sm:$0xff] }
  0xdb   : > { %4808 = vmatprep.mubr.msk.f32.mxu1 %vm264_vm1, %v6564_v20  ;;  %5032 = vmatprep.mubr.msk.f32.mxu0 %vm264_vm1, %v6565_v21  ;;  %v6577_v20 = vld [vmem:[#allocation13_spill] sm:$0xff] }
  0xde   : > { %4809 = vmatmul.mubr.msk.f32.gmra.mrb[4].mxu1 %vm264_vm1, %v6566_v1  ;;  %5033 = vmatmul.mubr.msk.f32.gmra.mrb[20].mxu0 %vm264_vm1, %v6567_v22  ;;  %v6225_v1 = vld [vmem:[%s5473_s27 + $0x181] sm:$0xff] }
  0xdf   : > { %4811 = vmatprep.mubr.msk.f32.mxu1 %vm264_vm1, %v6568_v23  ;;  %5035 = vmatprep.mubr.msk.f32.mxu0 %vm264_vm1, %v6569_v37  ;;  %v6578_v23 = vld [vmem:[#allocation26_spill] sm:$0xff] }
  0xe2   : > { %4812 = vmatmul.mubr.msk.f32.gmra.mrb[6].mxu1 %vm264_vm1, %v6570_v3  ;;  %5036 = vmatmul.mubr.msk.f32.gmra.mrb[22].mxu0 %vm264_vm1, %v6571_v33  ;;  %v6579_v3 = vld [vmem:[#allocation14_spill] sm:$0xff] }
  0xe3   : > { %4814 = vmatprep.mubr.msk.f32.mxu1 %vm264_vm1, %v6572_v61  ;;  %5038 = vmatprep.mubr.msk.f32.mxu0 %vm264_vm1, %v6573_v12  ;;  %v6580_v61 = vld [vmem:[#allocation28_spill] sm:$0xff] }
  0xe6   : > { %4815 = vmatmul.mubr.msk.f32.gmra.mrb[8].mxu1 %vm264_vm1, %v6574_v14  ;;  %5039 = vmatmul.mubr.msk.f32.gmra.mrb[24].mxu0 %vm264_vm1, %v6575_v16  ;;  %v6236_v14 = vld [vmem:[%s5473_s27 + $0x189] sm:$0xff] }
  0xe7   : > { %4817 = vmatprep.mubr.msk.f32.mxu1 %vm264_vm1, %v6576_v18  ;;  %5041 = vmatprep.mubr.msk.f32.mxu0 %vm264_vm1, %v6577_v20  ;;  %v4247_v18 = vld [vmem:[%s5473_s27 + $0x199] sm:$0xff] }
  0xea   : > { %4818 = vmatmul.mubr.msk.f32.gmra.mrb[10].mxu1 %vm264_vm1, %v6578_v23  ;;  %5042 = vmatmul.mubr.msk.f32.gmra.mrb[26].mxu0 %vm264_vm1, %v6579_v3  ;;  %v4248_v23 = vld [vmem:[%s5473_s27 + $0x1a1] sm:$0xff]  ;;  %v6582_v3 = vld [vmem:[#allocation32_spill] sm:$0xff] }
  0xeb   : > { %4820 = vmatprep.mubr.msk.f32.mxu1 %vm264_vm1, %v6580_v61  ;;  %5044 = vmatprep.mubr.msk.f32.mxu0 %vm264_vm1, %v6225_v1 }
  0xee   : > { %4821 = vmatmul.mubr.msk.f32.gmra.mrb[12].mxu1 %vm264_vm1, %v6581_v8  ;;  %5045 = vmatmul.mubr.msk.f32.gmra.mrb[28].mxu0 %vm264_vm1, %v6236_v14 }
  0xef   : > { %4823 = vmatprep.mubr.msk.f32.mxu1 %vm264_vm1, %v5914_v59  ;;  %5047 = vmatprep.mubr.msk.f32.mxu0 %vm264_vm1, %v4247_v18 }
  0xf2   : > { %4824 = vmatmul.mubr.msk.f32.gmra.mrb[14].mxu1 %vm264_vm1, %v6582_v3  ;;  %5048 = vmatmul.mubr.msk.f32.gmra.mrb[30].mxu0 %vm264_vm1, %v4248_v23 }
  0xf3   : > { %4826 = vmatprep.mubr.msk.f32.mxu1 %vm264_vm1, %v5928_v29  ;;  %5052 = vmatprep.mubr.msk.f32.mxu0 %vm264_vm1, %v5606_v27  ;;  %v6584_v27 = vld [vmem:[#allocation29_spill] sm:$0xff] }
  0xf4   : > { %v4313_v29 = vld [vmem:[%s5473_s27 + $0x19a] sm:$0xff] }
  0xf6   : > { %4827 = vmatmul.mubr.msk.f32.gmra.mrb[16].mxu1 %vm264_vm1, %v5944_v31  ;;  %5053 = vmatmul.mubr.msk.f32.vlgmr.msra.gmra.mrb[0].mxu0 %vm264_vm1, %v5624_v30  ;;  %v6585_v30 = vld [vmem:[#allocation14_spill] sm:$0xff]  ;;  %v6586_v31 = vld [vmem:[#allocation31_spill] sm:$0xff] }
  0xf7   : > { %4829 = vmatprep.mubr.msk.f32.mxu1 %vm264_vm1, %v5949_v0  ;;  %5055 = vmatprep.mubr.msk.f32.mxu0 %vm264_vm1, %v5632_v32  ;;  %v4314_v32 = vld [vmem:[%s5473_s27 + $0x1a2] sm:$0xff] }
  0xfa   : > { %4830 = vmatmul.mubr.msk.f32.gmra.mrb[18].mxu1 %vm264_vm1, %v5962_v28  ;;  %5056 = vmatmul.mubr.msk.f32.gmra.mrb[2].mxu0 %vm264_vm1, %v5648_v34 }
  0xfb   : > { %4832 = vmatprep.mubr.msk.f32.mxu1 %vm264_vm1, %v5965_v5  ;;  %5058 = vmatprep.mubr.msk.f32.mxu0 %vm264_vm1, %v5654_v36 }
  0xfe   : > { %4833 = vmatmul.mubr.msk.f32.gmra.mrb[20].mxu1 %vm264_vm1, %v5976_v7  ;;  %5059 = vmatmul.mubr.msk.f32.gmra.mrb[4].mxu0 %vm264_vm1, %v5668_v38 }
  0xff   : > { %4835 = vmatprep.mubr.msk.f32.mxu1 %vm264_vm1, %v5979_v10  ;;  %5061 = vmatprep.mubr.msk.f32.mxu0 %vm264_vm1, %v5674_v40 }
 0x102   : > { %4836 = vmatmul.mubr.msk.f32.gmra.mrb[22].mxu1 %vm264_vm1, %v5990_v57  ;;  %5062 = vmatmul.mubr.msk.f32.gmra.mrb[6].mxu0 %vm264_vm1, %v5688_v42 }
 0x103   : > { %4838 = vmatprep.mubr.msk.f32.mxu1 %vm264_vm1, %v5993_v51  ;;  %5064 = vmatprep.mubr.msk.f32.mxu0 %vm264_vm1, %v5694_v44 }
 0x106   : > { %4839 = vmatmul.mubr.msk.f32.gmra.mrb[24].mxu1 %vm264_vm1, %v6004_v47  ;;  %5065 = vmatmul.mubr.msk.f32.gmra.mrb[8].mxu0 %vm264_vm1, %v5708_v46 }
 0x107   : > { %4841 = vmatprep.mubr.msk.f32.mxu1 %vm264_vm1, %v6007_v43  ;;  %5067 = vmatprep.mubr.msk.f32.mxu0 %vm264_vm1, %v5714_v48 }
 0x10a   : > { %4842 = vmatmul.mubr.msk.f32.gmra.mrb[26].mxu1 %vm264_vm1, %v6018_v39  ;;  %5068 = vmatmul.mubr.msk.f32.gmra.mrb[10].mxu0 %vm264_vm1, %v5728_v50 }
 0x10b   : > { %4844 = vmatprep.mubr.msk.f32.mxu1 %vm264_vm1, %v6021_v35  ;;  %5070 = vmatprep.mubr.msk.f32.mxu0 %vm264_vm1, %v5734_v52  ;;  %v6389_v52 = vld [vmem:[%s6476_s2] ss:$0 sm:$0xff] }
 0x10e   : > { %4845 = vmatmul.mubr.msk.f32.gmra.mrb[28].mxu1 %vm264_vm1, %v6032_v62  ;;  %5071 = vmatmul.mubr.msk.f32.gmra.mrb[12].mxu0 %vm264_vm1, %v5748_v54 }
 0x10f   : > { %4847 = vmatprep.mubr.msk.f32.mxu1 %vm264_vm1, %v6087_v24  ;;  %5073 = vmatprep.mubr.msk.f32.mxu0 %vm264_vm1, %v5752_v56 }
 0x112   : > { %4848 = vmatmul.mubr.msk.f32.gmra.mrb[30].mxu1 %vm264_vm1, %v6098_v25  ;;  %5074 = vmatmul.mubr.msk.f32.gmra.mrb[14].mxu0 %vm264_vm1, %v5763_v58 }
 0x113   : > { %4876 = vmatprep.mubr.msk.f32.mxu1 %vm264_vm1, %v5603_v26  ;;  %5076 = vmatprep.mubr.msk.f32.mxu0 %vm264_vm1, %v5769_v60  ;;  %v6583_v26 = vld [vmem:[#allocation27_spill] sm:$0xff] }
 0x116   : > { %4877 = vmatmul.mubr.msk.f32.vlgmr.msra.gmra.mrb[16].mxu1 %vm264_vm1, %v6555_v11  ;;  %5077 = vmatmul.mubr.msk.f32.gmra.mrb[16].mxu0 %vm264_vm1, %v5787_v63 }
 0x117   : > { %4879 = vmatprep.mubr.msk.f32.mxu1 %vm264_vm1, %v6557_v13  ;;  %5079 = vmatprep.mubr.msk.f32.mxu0 %vm264_vm1, %v5795_v2 }
 0x11a   : > { %4880 = vmatmul.mubr.msk.f32.gmra.mrb[18].mxu1 %vm264_vm1, %v6559_v15  ;;  %5080 = vmatmul.mubr.msk.f32.gmra.mrb[18].mxu0 %vm264_vm1, %v5811_v4 }
 0x11b   : > { %4882 = vmatprep.mubr.msk.f32.mxu1 %vm264_vm1, %v6561_v17  ;;  %5082 = vmatprep.mubr.msk.f32.mxu0 %vm264_vm1, %v5817_v6 }
 0x11e   : > { %4883 = vmatmul.mubr.msk.f32.gmra.mrb[20].mxu1 %vm264_vm1, %v6563_v19  ;;  %5083 = vmatmul.mubr.msk.f32.gmra.mrb[20].mxu0 %vm264_vm1, %v5831_v9 }
 0x11f   : > { %4885 = vmatprep.mubr.msk.f32.mxu1 %vm264_vm1, %v6565_v21  ;;  %5085 = vmatprep.mubr.msk.f32.mxu0 %vm264_vm1, %v5837_v55 }
 0x122   : > { %4886 = vmatmul.mubr.msk.f32.gmra.mrb[22].mxu1 %vm264_vm1, %v6567_v22  ;;  %5086 = vmatmul.mubr.msk.f32.gmra.mrb[22].mxu0 %vm264_vm1, %v5851_v53 }
 0x123   : > { %4888 = vmatprep.mubr.msk.f32.mxu1 %vm264_vm1, %v6569_v37  ;;  %5088 = vmatprep.mubr.msk.f32.mxu0 %vm264_vm1, %v5857_v49 }
 0x126   : > { %4889 = vmatmul.mubr.msk.f32.gmra.mrb[24].mxu1 %vm264_vm1, %v6571_v33  ;;  %5089 = vmatmul.mubr.msk.f32.gmra.mrb[24].mxu0 %vm264_vm1, %v5871_v45 }
 0x127   : > { %4891 = vmatprep.mubr.msk.f32.mxu1 %vm264_vm1, %v6573_v12  ;;  %5091 = vmatprep.mubr.msk.f32.mxu0 %vm264_vm1, %v5877_v41 }
 0x12a   : > { %4892 = vmatmul.mubr.msk.f32.gmra.mrb[26].mxu1 %vm264_vm1, %v6575_v16  ;;  %5092 = vmatmul.mubr.msk.f32.gmra.mrb[26].mxu0 %vm264_vm1, %v6583_v26 }
 0x12b   : > { %4894 = vmatprep.mubr.msk.f32.mxu1 %vm264_vm1, %v6577_v20  ;;  %5094 = vmatprep.mubr.msk.f32.mxu0 %vm264_vm1, %v6584_v27 }
 0x12e   : > { %4895 = vmatmul.mubr.msk.f32.gmra.mrb[28].mxu1 %vm264_vm1, %v6585_v30  ;;  %5095 = vmatmul.mubr.msk.f32.gmra.mrb[28].mxu0 %vm264_vm1, %v6586_v31 }
 0x12f   : > { %4897 = vmatprep.mubr.msk.f32.mxu1 %vm264_vm1, %v6225_v1  ;;  %5097 = vmatprep.mubr.msk.f32.mxu0 %vm264_vm1, %v4313_v29 }
 0x132   : > { %4898 = vmatmul.mubr.msk.f32.gmra.mrb[30].mxu1 %vm264_vm1, %v6236_v14  ;;  %5098 = vmatmul.mubr.msk.f32.gmra.mrb[30].mxu0 %vm264_vm1, %v4314_v32 }
 0x1a9   : > { %v4804_v34 = vpop.f32.mrb[0].mxu1 }
 0x1aa   : > { %v1506_v35 = vpop.f32.mrb[1].mxu1 }
 0x1ad   : > { %v4807_v36 = vpop.f32.mrb[2].mxu1 }
 0x1ae   : > { %v1516_v38 = vpop.f32.mrb[3].mxu1 }
 0x1b1   : > { %v4810_v39 = vpop.f32.mrb[4].mxu1 }
 0x1b2   : > { %v1526_v40 = vpop.f32.mrb[5].mxu1 }
 0x1b5   : > { %v4813_v41 = vpop.f32.mrb[6].mxu1 }
 0x1b6   : > { %v1536_v42 = vpop.f32.mrb[7].mxu1 }
 0x1b9   : > { %v4816_v43 = vpop.f32.mrb[8].mxu1 }
 0x1ba   : > { %v1546_v44 = vpop.f32.mrb[9].mxu1 }
 0x1bd   : > { %v4819_v45 = vpop.f32.mrb[10].mxu1 }
 0x1be   : > { %v1556_v46 = vpop.f32.mrb[11].mxu1 }
 0x1c1   : > { %v6378_v47 = vpop.f32.mrb[12].mxu1 }
 0x1c2   : > { %v6380_v48 = vpop.f32.mrb[13].mxu1 }
 0x1c5   : > { %v6382_v49 = vpop.f32.mrb[14].mxu1 }
 0x1c6   : > { %v6384_v50 = vpop.f32.mrb[15].mxu1 }
 0x1c9   : > { %v5054_v51 = vpop.f32.mrb[0].mxu0 }
 0x1ca   : > { %v5102_v53 = vadd.f32 %v5054_v51, %v4804_v34  ;;  %v3459_v54 = vpop.f32.mrb[1].mxu0 }
 0x1cb   : > { %v5103_v56 = vadd.f32 %v3459_v54, %v1506_v35 }
 0x1cc   : > { %v3658_v58 = vadd.f32 %v5102_v53, %v6389_v52 }
 0x1cd   : > { %v3657_v59 = vadd.f32 %v5103_v56, %v6389_v52  ;;  %v5057_v60 = vpop.f32.mrb[2].mxu0 }
 0x1ce   : > { %v3690_v62 = vmax.f32 %v3658_v58, 0.0  ;;  %v5104_v63 = vadd.f32 %v5057_v60, %v4807_v36  ;;  %v3469_v0 = vpop.f32.mrb[3].mxu0 }
 0x1cf   : > { %v3689_v2 = vmax.f32 %v3657_v59, 0.0  ;;  %v5105_v4 = vadd.f32 %v3469_v0, %v1516_v38 }
 0x1d0   : > { %3722 = vst [vmem:[%s6396_s20 + $0x8] sm:$0xff] %v3690_v62  ;;  %v3660_v5 = vadd.f32 %v5104_v63, %v6389_v52 }
 0x1d1   : > { %3721 = vst [vmem:[%s6396_s20] sm:$0xff] %v3689_v2  ;;  %v3659_v6 = vadd.f32 %v5105_v4, %v6389_v52  ;;  %v5060_v7 = vpop.f32.mrb[4].mxu0 }
 0x1d2   : > { %v3692_v9 = vmax.f32 %v3660_v5, 0.0  ;;  %v5106_v10 = vadd.f32 %v5060_v7, %v4810_v39  ;;  %v3479_v55 = vpop.f32.mrb[5].mxu0 }
 0x1d3   : > { %v3691_v57 = vmax.f32 %v3659_v6, 0.0  ;;  %v5107_v28 = vadd.f32 %v3479_v55, %v1526_v40 }
 0x1d4   : > { %3724 = vst [vmem:[%s6396_s20 + $0x18] sm:$0xff] %v3692_v9  ;;  %v3662_v24 = vadd.f32 %v5106_v10, %v6389_v52 }
 0x1d5   : > { %3723 = vst [vmem:[%s6396_s20 + $0x10] sm:$0xff] %v3691_v57  ;;  %v3661_v25 = vadd.f32 %v5107_v28, %v6389_v52  ;;  %v5063_v8 = vpop.f32.mrb[6].mxu0 }
 0x1d6   : > { %v3694_v11 = vmax.f32 %v3662_v24, 0.0  ;;  %v5108_v13 = vadd.f32 %v5063_v8, %v4813_v41  ;;  %v3489_v15 = vpop.f32.mrb[7].mxu0 }
 0x1d7   : > { %v3693_v17 = vmax.f32 %v3661_v25, 0.0  ;;  %v5109_v19 = vadd.f32 %v3489_v15, %v1536_v42 }
 0x1d8   : > { %3726 = vst [vmem:[%s6396_s20 + $0x28] sm:$0xff] %v3694_v11  ;;  %v3664_v21 = vadd.f32 %v5108_v13, %v6389_v52 }
 0x1d9   : > { %3725 = vst [vmem:[%s6396_s20 + $0x20] sm:$0xff] %v3693_v17  ;;  %v3663_v22 = vadd.f32 %v5109_v19, %v6389_v52  ;;  %v5066_v37 = vpop.f32.mrb[8].mxu0 }
 0x1da   : > { %v3696_v33 = vmax.f32 %v3664_v21, 0.0  ;;  %v5110_v12 = vadd.f32 %v5066_v37, %v4816_v43  ;;  %v3499_v16 = vpop.f32.mrb[9].mxu0 }
 0x1db   : > { %v3695_v20 = vmax.f32 %v3663_v22, 0.0  ;;  %v5111_v1 = vadd.f32 %v3499_v16, %v1546_v44 }
 0x1dc   : > { %3728 = vst [vmem:[%s6396_s20 + $0x38] sm:$0xff] %v3696_v33  ;;  %v3666_v3 = vadd.f32 %v5110_v12, %v6389_v52 }
 0x1dd   : > { %3727 = vst [vmem:[%s6396_s20 + $0x30] sm:$0xff] %v3695_v20  ;;  %v3665_v61 = vadd.f32 %v5111_v1, %v6389_v52  ;;  %v5069_v14 = vpop.f32.mrb[10].mxu0 }
 0x1de   : > { %v3698_v18 = vmax.f32 %v3666_v3, 0.0  ;;  %v5112_v23 = vadd.f32 %v5069_v14, %v4819_v45  ;;  %v3509_v26 = vpop.f32.mrb[11].mxu0 }
 0x1df   : > { %v3697_v27 = vmax.f32 %v3665_v61, 0.0  ;;  %v5113_v29 = vadd.f32 %v3509_v26, %v1556_v46 }
 0x1e0   : > { %3730 = vst [vmem:[%s6396_s20 + $0x48] sm:$0xff] %v3698_v18  ;;  %v3668_v30 = vadd.f32 %v5112_v23, %v6389_v52 }
 0x1e1   : > { %3729 = vst [vmem:[%s6396_s20 + $0x40] sm:$0xff] %v3697_v27  ;;  %v3667_v31 = vadd.f32 %v5113_v29, %v6389_v52  ;;  %v5072_v32 = vpop.f32.mrb[12].mxu0 }
 0x1e2   : > { %v3700_v34 = vmax.f32 %v3668_v30, 0.0  ;;  %v5114_v35 = vadd.f32 %v5072_v32, %v6378_v47  ;;  %v3519_v36 = vpop.f32.mrb[13].mxu0 }
 0x1e3   : > { %v3699_v38 = vmax.f32 %v3667_v31, 0.0  ;;  %v5115_v39 = vadd.f32 %v3519_v36, %v6380_v48 }
 0x1e4   : > { %3732 = vst [vmem:[%s6396_s20 + $0x58] sm:$0xff] %v3700_v34  ;;  %v3670_v40 = vadd.f32 %v5114_v35, %v6389_v52 }
 0x1e5   : > { %3731 = vst [vmem:[%s6396_s20 + $0x50] sm:$0xff] %v3699_v38  ;;  %v3669_v41 = vadd.f32 %v5115_v39, %v6389_v52  ;;  %v5075_v42 = vpop.f32.mrb[14].mxu0 }
 0x1e6   : > { %v3702_v43 = vmax.f32 %v3670_v40, 0.0  ;;  %v5116_v44 = vadd.f32 %v5075_v42, %v6382_v49  ;;  %v3529_v45 = vpop.f32.mrb[15].mxu0 }
 0x1e7   : > { %v3701_v46 = vmax.f32 %v3669_v41, 0.0  ;;  %v5117_v47 = vadd.f32 %v3529_v45, %v6384_v50 }
 0x1e8   : > { %3734 = vst [vmem:[%s6396_s20 + $0x68] sm:$0xff] %v3702_v43  ;;  %v3672_v51 = vadd.f32 %v5116_v44, %v6389_v52 }
 0x1e9   : > { %3733 = vst [vmem:[%s6396_s20 + $0x60] sm:$0xff] %v3701_v46  ;;  %v3671_v48 = vadd.f32 %v5117_v47, %v6389_v52  ;;  %v4878_v53 = vpop.f32.mrb[16].mxu1  ;;  %v5078_v54 = vpop.f32.mrb[16].mxu0 }
 0x1ea   : > { %v3704_v56 = vmax.f32 %v3672_v51, 0.0  ;;  %v5118_v58 = vadd.f32 %v5078_v54, %v4878_v53  ;;  %v1976_v59 = vpop.f32.mrb[17].mxu1  ;;  %v3539_v60 = vpop.f32.mrb[17].mxu0 }
 0x1eb   : > { %v3703_v49 = vmax.f32 %v3671_v48, 0.0  ;;  %v5119_v62 = vadd.f32 %v3539_v60, %v1976_v59 }
 0x1ec   : > { %3736 = vst [vmem:[%s6396_s20 + $0x78] sm:$0xff] %v3704_v56  ;;  %v3674_v63 = vadd.f32 %v5118_v58, %v6389_v52 }
 0x1ed   : > { %3735 = vst [vmem:[%s6396_s20 + $0x70] sm:$0xff] %v3703_v49  ;;  %v3673_v50 = vadd.f32 %v5119_v62, %v6389_v52  ;;  %v4881_v0 = vpop.f32.mrb[18].mxu1  ;;  %v5081_v2 = vpop.f32.mrb[18].mxu0 }
 0x1ee   : > { %v3706_v4 = vmax.f32 %v3674_v63, 0.0  ;;  %v5120_v5 = vadd.f32 %v5081_v2, %v4881_v0  ;;  %v1986_v6 = vpop.f32.mrb[19].mxu1  ;;  %v3549_v7 = vpop.f32.mrb[19].mxu0 }
 0x1ef   : > { %v3705_v9 = vmax.f32 %v3673_v50, 0.0  ;;  %v5121_v10 = vadd.f32 %v3549_v7, %v1986_v6 }
 0x1f0   : > { %3738 = vst [vmem:[%s6396_s20 + $0x88] sm:$0xff] %v3706_v4  ;;  %v3676_v55 = vadd.f32 %v5120_v5, %v6389_v52 }
 0x1f1   : > { %3737 = vst [vmem:[%s6396_s20 + $0x80] sm:$0xff] %v3705_v9  ;;  %v3675_v57 = vadd.f32 %v5121_v10, %v6389_v52  ;;  %v4884_v28 = vpop.f32.mrb[20].mxu1  ;;  %v5084_v24 = vpop.f32.mrb[20].mxu0 }
 0x1f2   : > { %v3708_v25 = vmax.f32 %v3676_v55, 0.0  ;;  %v5122_v8 = vadd.f32 %v5084_v24, %v4884_v28  ;;  %v1996_v11 = vpop.f32.mrb[21].mxu1  ;;  %v3559_v13 = vpop.f32.mrb[21].mxu0 }
 0x1f3   : > { %v3707_v15 = vmax.f32 %v3675_v57, 0.0  ;;  %v5123_v17 = vadd.f32 %v3559_v13, %v1996_v11 }
 0x1f4   : > { %3740 = vst [vmem:[%s6396_s20 + $0x98] sm:$0xff] %v3708_v25  ;;  %v3678_v19 = vadd.f32 %v5122_v8, %v6389_v52 }
 0x1f5   : > { %3739 = vst [vmem:[%s6396_s20 + $0x90] sm:$0xff] %v3707_v15  ;;  %v3677_v21 = vadd.f32 %v5123_v17, %v6389_v52  ;;  %v4887_v22 = vpop.f32.mrb[22].mxu1  ;;  %v5087_v37 = vpop.f32.mrb[22].mxu0 }
 0x1f6   : > { %v3710_v33 = vmax.f32 %v3678_v19, 0.0  ;;  %v5124_v12 = vadd.f32 %v5087_v37, %v4887_v22  ;;  %v2006_v16 = vpop.f32.mrb[23].mxu1  ;;  %v3569_v20 = vpop.f32.mrb[23].mxu0 }
 0x1f7   : > { %v3709_v1 = vmax.f32 %v3677_v21, 0.0  ;;  %v5125_v3 = vadd.f32 %v3569_v20, %v2006_v16 }
 0x1f8   : > { %3742 = vst [vmem:[%s6396_s20 + $0xa8] sm:$0xff] %v3710_v33  ;;  %v3680_v61 = vadd.f32 %v5124_v12, %v6389_v52 }
 0x1f9   : > { %3741 = vst [vmem:[%s6396_s20 + $0xa0] sm:$0xff] %v3709_v1  ;;  %v3679_v14 = vadd.f32 %v5125_v3, %v6389_v52  ;;  %v4890_v18 = vpop.f32.mrb[24].mxu1  ;;  %v5090_v23 = vpop.f32.mrb[24].mxu0 }
 0x1fa   : > { %v3712_v26 = vmax.f32 %v3680_v61, 0.0  ;;  %v5126_v27 = vadd.f32 %v5090_v23, %v4890_v18  ;;  %v2016_v29 = vpop.f32.mrb[25].mxu1  ;;  %v3579_v30 = vpop.f32.mrb[25].mxu0 }
 0x1fb   : > { %v3711_v31 = vmax.f32 %v3679_v14, 0.0  ;;  %v5127_v32 = vadd.f32 %v3579_v30, %v2016_v29 }
 0x1fc   : > { %3744 = vst [vmem:[%s6396_s20 + $0xb8] sm:$0xff] %v3712_v26  ;;  %v3682_v34 = vadd.f32 %v5126_v27, %v6389_v52 }
 0x1fd   : > { %3743 = vst [vmem:[%s6396_s20 + $0xb0] sm:$0xff] %v3711_v31  ;;  %v3681_v35 = vadd.f32 %v5127_v32, %v6389_v52  ;;  %v4893_v36 = vpop.f32.mrb[26].mxu1  ;;  %v5093_v38 = vpop.f32.mrb[26].mxu0 }
 0x1fe   : > { %v3714_v39 = vmax.f32 %v3682_v34, 0.0  ;;  %v5128_v40 = vadd.f32 %v5093_v38, %v4893_v36  ;;  %v2026_v41 = vpop.f32.mrb[27].mxu1  ;;  %v3589_v42 = vpop.f32.mrb[27].mxu0 }
 0x1ff   : > { %v3713_v43 = vmax.f32 %v3681_v35, 0.0  ;;  %v5129_v44 = vadd.f32 %v3589_v42, %v2026_v41 }
 0x200   : > { %3746 = vst [vmem:[%s6396_s20 + $0xc8] sm:$0xff] %v3714_v39  ;;  %v3684_v45 = vadd.f32 %v5128_v40, %v6389_v52 }
 0x201   : > { %3745 = vst [vmem:[%s6396_s20 + $0xc0] sm:$0xff] %v3713_v43  ;;  %v3683_v46 = vadd.f32 %v5129_v44, %v6389_v52  ;;  %v4896_v47 = vpop.f32.mrb[28].mxu1  ;;  %v5096_v51 = vpop.f32.mrb[28].mxu0 }
 0x202   : > { %v3716_v48 = vmax.f32 %v3684_v45, 0.0  ;;  %v5130_v53 = vadd.f32 %v5096_v51, %v4896_v47  ;;  %v2036_v54 = vpop.f32.mrb[29].mxu1  ;;  %v3599_v56 = vpop.f32.mrb[29].mxu0 }
 0x203   : > { %v3715_v58 = vmax.f32 %v3683_v46, 0.0  ;;  %v5131_v59 = vadd.f32 %v3599_v56, %v2036_v54 }
 0x204   : > { %3748 = vst [vmem:[%s6396_s20 + $0xd8] sm:$0xff] %v3716_v48  ;;  %v3686_v60 = vadd.f32 %v5130_v53, %v6389_v52 }
 0x205   : > { %3747 = vst [vmem:[%s6396_s20 + $0xd0] sm:$0xff] %v3715_v58  ;;  %v3685_v49 = vadd.f32 %v5131_v59, %v6389_v52  ;;  %v4899_v62 = vpop.f32.mrb[30].mxu1  ;;  %v5099_v63 = vpop.f32.mrb[30].mxu0 }
 0x206   : > { %v3718_v50 = vmax.f32 %v3686_v60, 0.0  ;;  %v5132_v0 = vadd.f32 %v5099_v63, %v4899_v62  ;;  %v2046_v2 = vpop.f32.mrb[31].mxu1  ;;  %v3609_v4 = vpop.f32.mrb[31].mxu0 }
 0x207   : > { %v3717_v5 = vmax.f32 %v3685_v49, 0.0  ;;  %v5133_v6 = vadd.f32 %v3609_v4, %v2046_v2 }
 0x208   : > { %3750 = vst [vmem:[%s6396_s20 + $0xe8] sm:$0xff] %v3718_v50  ;;  %v3688_v7 = vadd.f32 %v5132_v0, %v6389_v52 }
 0x209   : > { %3749 = vst [vmem:[%s6396_s20 + $0xe0] sm:$0xff] %v3717_v5  ;;  %v3687_v9 = vadd.f32 %v5133_v6, %v6389_v52 }
 0x20a   : > { %v3720_v10 = vmax.f32 %v3688_v7, 0.0 }
 0x20b   : > { %v3719_v55 = vmax.f32 %v3687_v9, 0.0 }
 0x20c   : > { %3752 = vst [vmem:[%s6396_s20 + $0xf8] sm:$0xff] %v3720_v10 }
 0x20d   : > { %3751 = vst [vmem:[%s6396_s20 + $0xf0] sm:$0xff] %v3719_v55 }
 0x20e PF: > { %s13_s14 = sadd.s32 1, %s5405_s14   ;;  %s6587_s12 = smov %s5401_s13 }
 0x20f   : > { %p10_p5 = scmp.ge.s32.totalorder %s13_s14, 4   ;;  %s6588_s13 = smov %s6590_s15 }
 0x211   :  { %12 = sbr.rel (!%p10_p5) target bundleno = 2 (0x2), region = 73 }

</bundles_post_ra>
